<compile_context>
chip_gen: v6e
topology: v6e:2x2x1
jax: 0.10.0
libtpu: 0.0.40
codegen_flags: <defaults>
</compile_context>

<pallas_src>
import functools
import math

import numpy as np
import jax
import jax.numpy as jnp
from jax.experimental import pallas as pl
from jax.experimental.pallas import tpu as pltpu

EPS = 1e-8

# vocab special ids (mirrors word2idx[PAD/UNK/BOS/EOS/<sep>])
PAD, UNK, BOS, EOS, SEP = 0, 1, 2, 3, 4

# bf16 matmul operands (2-4x MXU throughput on v6e/v7x), f32 accumulation.
MATMUL_DTYPE = jnp.bfloat16

_VMEM_LIMIT = 32 * 1024 * 1024  # explicit scoped-VMEM budget (v5e default is 16 MiB)


def _cparams(*sems):
    return pltpu.CompilerParams(dimension_semantics=tuple(sems),
                                vmem_limit_bytes=_VMEM_LIMIT)


# ----------------------------------------------------------------------------
# Tiling helper
# ----------------------------------------------------------------------------

def _pick_tile(dim, target, mult):
    """Largest divisor of `dim` that is <= target and a multiple of `mult`;
    falls back to the full dim (always satisfies the (8,128) rule)."""
    # TODO(synk): pad + masked last tile instead of the full-dim fallback so that
    #             awkward dims cannot produce a single oversized block.
    if dim <= target:
        return dim
    t = (target // mult) * mult
    while t >= mult:
        if dim % t == 0:
            return t
        t -= mult
    return dim


# ----------------------------------------------------------------------------
# Pallas kernels
# ----------------------------------------------------------------------------

def linear(x, w, b, activation=None):
    """y = x @ w + b (optionally relu). x: [M, K] f32, w: [K, N] (bf16 ok), b: [N] f32.
    Tiled (M, N, K) matmul, bf16 MXU operands, f32 VMEM accumulator."""
    M, K = x.shape
    N = w.shape[1]
    tm = _pick_tile(M, 256, 8)
    tn = _pick_tile(N, 256, 128)
    tk = _pick_tile(K, 512, 128)

    def kernel(x_ref, w_ref, b_ref, o_ref, acc_ref):
        @pl.when(pl.program_id(2) == 0)
        def _init():
            acc_ref[...] = jnp.zeros_like(acc_ref)

        acc_ref[...] += jnp.dot(
            x_ref[...].astype(MATMUL_DTYPE),
            w_ref[...].astype(MATMUL_DTYPE),
            preferred_element_type=jnp.float32)

        @pl.when(pl.program_id(2) == pl.num_programs(2) - 1)
        def _fin():
            y = acc_ref[...] + b_ref[...]
            if activation == "relu":
                y = jnp.maximum(y, 0.0)
            o_ref[...] = y

    return pl.pallas_call(
        kernel,
        out_shape=jax.ShapeDtypeStruct((M, N), jnp.float32),
        grid=(M // tm, N // tn, K // tk),
        in_specs=[
            pl.BlockSpec((tm, tk), lambda i, j, k: (i, k)),
            pl.BlockSpec((tk, tn), lambda i, j, k: (k, j)),
            pl.BlockSpec((1, tn), lambda i, j, k: (0, j)),
        ],
        out_specs=pl.BlockSpec((tm, tn), lambda i, j, k: (i, j)),
        scratch_shapes=[pltpu.VMEM((tm, tn), jnp.float32)],
        compiler_params=_cparams("parallel", "parallel", "arbitrary"),
    )(x, w, b.reshape(1, N))


def layer_norm_residual(x, res, g, b, eps=1e-5):
    """LayerNorm(x + res) over the last dim. x, res: [..., D]. Fused residual (f32)."""
    shape = x.shape
    D = shape[-1]
    x2 = x.reshape(-1, D)
    r2 = res.reshape(-1, D)
    M = x2.shape[0]
    tm = _pick_tile(M, 256, 8)

    def kernel(x_ref, r_ref, g_ref, b_ref, o_ref):
        xx = x_ref[...] + r_ref[...]
        mu = jnp.mean(xx, axis=-1, keepdims=True)
        var = jnp.mean((xx - mu) ** 2, axis=-1, keepdims=True)
        o_ref[...] = (xx - mu) * jax.lax.rsqrt(var + eps) * g_ref[...] + b_ref[...]

    out = pl.pallas_call(
        kernel,
        out_shape=jax.ShapeDtypeStruct((M, D), jnp.float32),
        grid=(M // tm,),
        in_specs=[
            pl.BlockSpec((tm, D), lambda i: (i, 0)),
            pl.BlockSpec((tm, D), lambda i: (i, 0)),
            pl.BlockSpec((1, D), lambda i: (0, 0)),
            pl.BlockSpec((1, D), lambda i: (0, 0)),
        ],
        out_specs=pl.BlockSpec((tm, D), lambda i: (i, 0)),
        compiler_params=_cparams("parallel"),
    )(x2, r2, g.reshape(1, D), b.reshape(1, D))
    return out.reshape(shape)


def mha_attention(q, k, v, n_heads, d_model, *, key_mask=None, causal=False,
                  return_attn=False, q_slab=0, k_slab=0, v_slab=0):
    """Multi-head scaled-dot-product attention, one (batch/beam) slice per grid step.

    q/k/v: [B, S, n_slabs*D] arrays; the D-wide slab actually used is picked by the
    BlockSpec index_map (`*_slab`) -> zero-copy consumption of fused QKV / fused KV
    projections.  K/V are shared across beams via the index_map i -> i % Bkv.
    key_mask: [Bkv, Sk] (1 valid / 0 pad), causal mask built in-kernel.  All mask /
    softmax math stays f32; MXU operands are bf16 with f32 accumulation.  Per-head
    outputs are stored directly into o_ref's lane slice (no list + concat).
    Returns out [Bq, Sq, D] and, if return_attn, head-mean probs [Bq, Sq, Sk].
    """
    Bq, Sq, _ = q.shape
    Bkv, Sk, _ = k.shape
    D = d_model
    Dh = D // n_heads
    scale = 1.0 / math.sqrt(Dh)
    has_mask = key_mask is not None

    def kernel(*refs):
        q_ref, k_ref, v_ref = refs[0], refs[1], refs[2]
        nxt = 3
        m_ref = None
        if has_mask:
            m_ref = refs[3]
            nxt = 4
        o_ref = refs[nxt]
        p_ref = refs[nxt + 1] if return_attn else None

        qq = q_ref[0].astype(MATMUL_DTYPE)        # (Sq, D)
        kk = k_ref[0].astype(MATMUL_DTYPE)        # (Sk, D)
        vv = v_ref[0].astype(MATMUL_DTYPE)        # (Sk, D)

        bias = None
        if causal:
            rows = jax.lax.broadcasted_iota(jnp.int32, (Sq, Sk), 0)
            cols = jax.lax.broadcasted_iota(jnp.int32, (Sq, Sk), 1)
            bias = jnp.where(cols <= rows, 0.0, -1e9).astype(jnp.float32)
        if has_mask:
            kbias = (1.0 - m_ref[0]) * (-1e9)     # (1, Sk) f32
            bias = kbias if bias is None else bias + kbias

        p_acc = None
        for h in range(n_heads):                  # static unroll, one head live at a time
            lo = h * Dh
            qh = qq[:, lo:lo + Dh]
            kh = kk[:, lo:lo + Dh]
            vh = vv[:, lo:lo + Dh]
            s = jax.lax.dot_general(
                qh, kh, (((1,), (1,)), ((), ())),
                preferred_element_type=jnp.float32) * scale          # (Sq, Sk) f32
            if bias is not None:
                s = s + bias
            s = s - jnp.max(s, axis=-1, keepdims=True)
            e = jnp.exp(s)
            p = e * pl.reciprocal(jnp.sum(e, axis=-1, keepdims=True), approx=True)
            oh = jnp.dot(p.astype(MATMUL_DTYPE), vh,
                         preferred_element_type=jnp.float32)
            o_ref[0, :, lo:lo + Dh] = oh          # direct per-head store, no concat
            if return_attn:
                p_acc = p if p_acc is None else p_acc + p
        if return_attn:
            p_ref[0] = p_acc * (1.0 / n_heads)    # head-mean inside the kernel

    in_specs = [
        pl.BlockSpec((1, Sq, D), lambda i, _s=q_slab: (i, 0, _s)),
        pl.BlockSpec((1, Sk, D), lambda i, _s=k_slab: (i % Bkv, 0, _s)),
        pl.BlockSpec((1, Sk, D), lambda i, _s=v_slab: (i % Bkv, 0, _s)),
    ]
    args = [q, k, v]
    if has_mask:
        in_specs.append(pl.BlockSpec((1, 1, Sk), lambda i: (i % Bkv, 0, 0)))
        args.append(key_mask.reshape(Bkv, 1, Sk))

    # TODO(synk): pad Sk of the probability output to a lane-dense multiple of 128.
    if return_attn:
        out_shape = (jax.ShapeDtypeStruct((Bq, Sq, D), jnp.float32),
                     jax.ShapeDtypeStruct((Bq, Sq, Sk), jnp.float32))
        out_specs = (pl.BlockSpec((1, Sq, D), lambda i: (i, 0, 0)),
                     pl.BlockSpec((1, Sq, Sk), lambda i: (i, 0, 0)))
    else:
        out_shape = jax.ShapeDtypeStruct((Bq, Sq, D), jnp.float32)
        out_specs = pl.BlockSpec((1, Sq, D), lambda i: (i, 0, 0))

    return pl.pallas_call(
        kernel,
        out_shape=out_shape,
        grid=(Bq,),
        in_specs=in_specs,
        out_specs=out_specs,
        compiler_params=_cparams("parallel"),
    )(*args)


def log_softmax_rows(y):
    """Row-wise log(softmax(y) + EPS) with EXACT division (beam scores). y: [M, V]."""
    M, V = y.shape
    tm = _pick_tile(M, 8, 8)

    def kernel(y_ref, o_ref):
        yy = y_ref[...]
        m = jnp.max(yy, axis=-1, keepdims=True)
        e = jnp.exp(yy - m)
        p = e / jnp.sum(e, axis=-1, keepdims=True)   # exact (no approx reciprocal)
        o_ref[...] = jnp.log(p + EPS)

    return pl.pallas_call(
        kernel,
        out_shape=jax.ShapeDtypeStruct((M, V), jnp.float32),
        grid=(M // tm,),
        in_specs=[pl.BlockSpec((tm, V), lambda i: (i, 0))],
        out_specs=pl.BlockSpec((tm, V), lambda i: (i, 0)),
        compiler_params=_cparams("parallel"),
    )(y)


def vocab_log_dist(x, w, b):
    """log(softmax(x @ w + b) + EPS).  The (D, V) weight is consumed through the
    tiled `linear` kernel (V tiled on the N grid axis -> bounded VMEM on any vocab),
    then a small row log-softmax kernel finalizes."""
    logits = linear(x, w, b)
    return log_softmax_rows(logits)


# ----------------------------------------------------------------------------
# Transformer blocks (glue around the Pallas kernels)
# ----------------------------------------------------------------------------

def _split_or_slab(fused, n_slabs, d_model):
    """Return [(array, slab_index), ...] for attention consumption of a fused
    projection [B, S, n_slabs*D].  Zero-copy slab selection when D % 128 == 0
    (lane-aligned BlockSpec blocks), jnp.split fallback otherwise."""
    if d_model % 128 == 0:
        return [(fused, s) for s in range(n_slabs)]
    parts = jnp.split(fused, n_slabs, axis=-1)
    return [(p, 0) for p in parts]


def encoder_forward(params, src, src_mask, n_heads):
    B, S = src.shape
    D = params["embed"].shape[1]
    x = jnp.take(params["embed"], src, axis=0) + params["pos"][:S][None]
    for lp in params["enc_layers"]:
        qkv = linear(x.reshape(B * S, D), lp["self"]["wqkv"], lp["self"]["bqkv"])
        qkv = qkv.reshape(B, S, 3 * D)
        (qa, qs), (ka, ks), (va, vs) = _split_or_slab(qkv, 3, D)
        a = mha_attention(qa, ka, va, n_heads, D, key_mask=src_mask,
                          q_slab=qs, k_slab=ks, v_slab=vs)
        a = linear(a.reshape(B * S, D), lp["self"]["wo"], lp["self"]["bo"]).reshape(B, S, D)
        x = layer_norm_residual(x, a, lp["ln1_g"], lp["ln1_b"])
        h = linear(x.reshape(B * S, D), lp["w1"], lp["b1"], activation="relu")
        h = linear(h, lp["w2"], lp["b2"]).reshape(B, S, D)
        x = layer_norm_residual(x, h, lp["ln2_g"], lp["ln2_b"])
    return x


def encode_and_precompute(params, src, src_mask, n_heads):
    """Encoder + per-layer cross-attention K/V projection (done ONCE, not per step,
    and NOT tiled across beams)."""
    memory_bank = encoder_forward(params, src, src_mask, n_heads)
    B, S, D = memory_bank.shape
    cross_kv = []
    for lp in params["dec_layers"]:
        kv = linear(memory_bank.reshape(B * S, D), lp["cross"]["wkv"], lp["cross"]["bkv"])
        kc, vc = jnp.split(kv, 2, axis=-1)     # one-time split at encode time
        cross_kv.append((kc.reshape(B, S, D), vc.reshape(B, S, D)))
    return memory_bank, cross_kv


def decoder_step(params, cross_kv, dec_tokens, cur_len, src_mask, n_heads, beam_size):
    """One beam-search decoder step with STATIC (bucketed) shapes.

    dec_tokens: [beam*batch, T_bucket] int32, positions >= cur_len are PAD (the
    causal mask guarantees they never influence position cur_len-1).
    Returns per-row top-k scores (log(softmax+EPS)), token ids and the last-layer
    cross-attention row for the last valid position.
    """
    Bb, T = dec_tokens.shape
    D = params["embed"].shape[1]
    n_layers = len(params["dec_layers"])
    x = jnp.take(params["embed"], dec_tokens, axis=0) + params["pos"][:T][None]
    attn = None
    for li, lp in enumerate(params["dec_layers"]):
        # causal self-attention (fused QKV, zero-copy slabs, no prob output)
        qkv = linear(x.reshape(Bb * T, D), lp["self"]["wqkv"], lp["self"]["bqkv"])
        qkv = qkv.reshape(Bb, T, 3 * D)
        (qa, qs), (ka, ks), (va, vs) = _split_or_slab(qkv, 3, D)
        a = mha_attention(qa, ka, va, n_heads, D, causal=True,
                          q_slab=qs, k_slab=ks, v_slab=vs)
        a = linear(a.reshape(Bb * T, D), lp["self"]["wo"], lp["self"]["bo"]).reshape(Bb, T, D)
        x = layer_norm_residual(x, a, lp["ln1_g"], lp["ln1_b"])

        # cross attention: K/V precomputed per batch element, shared across beams;
        # probabilities only materialized for the LAST decoder layer.
        qx = linear(x.reshape(Bb * T, D), lp["cross"]["wq"], lp["cross"]["bq"]).reshape(Bb, T, D)
        kc, vc = cross_kv[li]
        if li == n_layers - 1:
            a, attn = mha_attention(qx, kc, vc, n_heads, D, key_mask=src_mask,
                                    return_attn=True)
        else:
            a = mha_attention(qx, kc, vc, n_heads, D, key_mask=src_mask)
        a = linear(a.reshape(Bb * T, D), lp["cross"]["wo"], lp["cross"]["bo"]).reshape(Bb, T, D)
        x = layer_norm_residual(x, a, lp["ln2_g"], lp["ln2_b"])

        # FFN
        h = linear(x.reshape(Bb * T, D), lp["w1"], lp["b1"], activation="relu")
        h = linear(h, lp["w2"], lp["b2"]).reshape(Bb, T, D)
        x = layer_norm_residual(x, h, lp["ln3_g"], lp["ln3_b"])

    # only project the LAST valid position through the vocab matmul + log-softmax
    x_last = jax.lax.dynamic_slice_in_dim(x, cur_len - 1, 1, axis=1)[:, 0, :]
    log_dist = vocab_log_dist(x_last, params["w_out"], params["b_out"])
    # device-side top-k: only (Bb, beam) scores + ids cross to the host per step
    topk_scores, topk_ids = jax.lax.top_k(log_dist, beam_size)
    attn_last = jax.lax.dynamic_slice_in_dim(attn, cur_len - 1, 1, axis=1)[:, 0, :]
    return topk_scores, topk_ids, attn_last


# ----------------------------------------------------------------------------
# Simplified beam (host-side numpy bookkeeping over top-k candidates)
# ----------------------------------------------------------------------------
# TODO(synk): GNMTGlobalScorer, block_ngram_repeat, exclusion tokens and the full
# finished-hypothesis sorting of the original Beam class are host-side Python
# logic with no Pallas equivalent; a plain top-k beam advance is used instead.

class SimpleBeam:
    def __init__(self, size, pad, bos, eos):
        self.size = size
        self.eos = eos
        self.scores = np.zeros((size,), np.float32)
        self.prev_ks = []
        first = np.full((size,), pad, np.int64)
        first[0] = bos
        self.next_ys = [first]
        self._done = False

    def get_current_tokens(self):
        return self.next_ys[-1]

    def get_current_origin(self):
        return self.prev_ks[-1]

    def done(self):
        return self._done

    def advance(self, cand_scores, cand_ids, attn):
        """cand_scores/cand_ids: per-parent-beam top-k candidates [beam, k]."""
        del attn  # coverage not used (global scorer is 'none')
        cand_scores = np.asarray(cand_scores, np.float32)
        cand_ids = np.asarray(cand_ids, np.int64)
        k = cand_scores.shape[-1]
        if self.prev_ks:
            beam_scores = cand_scores + self.scores[:, None]
        else:
            beam_scores = cand_scores[0:1]           # only beam 0 at the first step
        flat = beam_scores.reshape(-1)
        best = np.argsort(-flat)[: self.size]
        self.scores = flat[best].astype(np.float32)
        parents = (best // k).astype(np.int64)
        tokens = cand_ids[parents, best % k]
        self.prev_ks.append(parents)
        self.next_ys.append(tokens)
        if int(self.next_ys[-1][0]) == self.eos:
            self._done = True

    def get_hyp(self, k):
        hyp = []
        for j in range(len(self.prev_ks) - 1, -1, -1):
            hyp.append(int(self.next_ys[j + 1][k]))
            k = int(self.prev_ks[j][k])
        return hyp[::-1]


# ----------------------------------------------------------------------------
# Seq2SeqModel.forward equivalent
# ----------------------------------------------------------------------------

def seq2seq_forward(params, src, src_lens, src_oov, max_num_oov, src_mask,
                    n_heads, beam_size=5):
    del src_oov, max_num_oov  # TODO(synk): copy attention (src_oov scatter) not used (copy_attn=False)
    batch_size = src.shape[0]
    # Mirrors the reference's `for t in range(1, len(src_lens)+1)` decode budget.
    T_max = len(src_lens)

    encode = jax.jit(functools.partial(encode_and_precompute, n_heads=n_heads))
    step = jax.jit(functools.partial(decoder_step, n_heads=n_heads, beam_size=beam_size))

    memory_bank, cross_kv = encode(params, src, src_mask)
    del memory_bank  # cross K/V already projected; no beam tiling of the memory bank

    beams = [SimpleBeam(beam_size, PAD, BOS, EOS) for _ in range(batch_size)]
    Bb = beam_size * batch_size
    dec_tokens = np.full((Bb, T_max), PAD, np.int32)  # fixed-shape decoder inputs

    for t in range(1, T_max + 1):
        if all(b.done() for b in beams):
            break
        # Re-gather prefixes by the selected parent beams (beam backpointers).
        # NOTE: the reference concatenates without reordering; the review flagged
        # that as a correctness bug, so prefixes are permuted here.
        if t > 1:
            reordered = dec_tokens.copy()
            for bi, beam in enumerate(beams):
                origins = np.asarray(beam.get_current_origin(), dtype=np.int64)
                rows_new = np.arange(beam_size) * batch_size + bi
                rows_old = origins * batch_size + bi
                reordered[rows_new, : t - 1] = dec_tokens[rows_old, : t - 1]
            dec_tokens = reordered

        cur = np.stack([np.asarray(b.get_current_tokens()) for b in beams])  # [batch, beam]
        dec_tokens[:, t - 1] = cur.T.reshape(-1)  # beam-major flattening (as reference)

        # power-of-2 length bucket: bounded per-step work, no per-step recompiles
        T_b = min(1 << (t - 1).bit_length(), T_max)
        topk_scores, topk_ids, attn_last = step(
            params, cross_kv, jnp.asarray(dec_tokens[:, :T_b]),
            jnp.asarray(t, dtype=jnp.int32), src_mask)

        sc = np.asarray(topk_scores).reshape(beam_size, batch_size, -1)
        ids = np.asarray(topk_ids).reshape(beam_size, batch_size, -1)
        at = np.asarray(attn_last).reshape(beam_size, batch_size, -1)
        for bi, beam in enumerate(beams):
            beam.advance(sc[:, bi], ids[:, bi], at[:, bi, :src_lens[bi]])

    result_token = [[b.get_hyp(0)] for b in beams]
    final_scores = jnp.asarray(np.stack([b.scores for b in beams]))
    return result_token, final_scores


# ----------------------------------------------------------------------------
# Deterministic parameter init (shapes from the module's __init__)
# ----------------------------------------------------------------------------

def sinusoid_table(n_pos, d, padding_idx):
    pos = np.arange(n_pos)[:, None].astype(np.float64)
    i = np.arange(d)[None, :].astype(np.float64)
    angle = pos / np.power(10000.0, 2.0 * (i // 2) / d)
    tbl = np.zeros((n_pos, d))
    tbl[:, 0::2] = np.sin(angle[:, 0::2])
    tbl[:, 1::2] = np.cos(angle[:, 1::2])
    tbl[padding_idx] = 0.0
    return jnp.asarray(tbl, jnp.float32)


def init_params(key, vocab_size, d_model, d_ff, n_enc_layers, n_dec_layers, max_pos):
    keys = iter(jax.random.split(key, 512))

    def w(shape, scale=0.02):
        # matmul weights stored in bf16 (MXU-native, half the weight DMA)
        return (scale * jax.random.normal(next(keys), shape)).astype(MATMUL_DTYPE)

    def self_attn_p():
        # Q|K|V fused into one (D, 3D) projection
        return dict(
            wqkv=w((d_model, 3 * d_model)), bqkv=jnp.zeros((3 * d_model,), jnp.float32),
            wo=w((d_model, d_model)), bo=jnp.zeros((d_model,), jnp.float32),
        )

    def cross_attn_p():
        # K|V fused (applied once to the memory bank), Q kept separate (per step)
        return dict(
            wq=w((d_model, d_model)), bq=jnp.zeros((d_model,), jnp.float32),
            wkv=w((d_model, 2 * d_model)), bkv=jnp.zeros((2 * d_model,), jnp.float32),
            wo=w((d_model, d_model)), bo=jnp.zeros((d_model,), jnp.float32),
        )

    def enc_layer_p():
        return dict(
            self=self_attn_p(),
            ln1_g=jnp.ones((d_model,), jnp.float32), ln1_b=jnp.zeros((d_model,), jnp.float32),
            w1=w((d_model, d_ff)), b1=jnp.zeros((d_ff,), jnp.float32),
            w2=w((d_ff, d_model)), b2=jnp.zeros((d_model,), jnp.float32),
            ln2_g=jnp.ones((d_model,), jnp.float32), ln2_b=jnp.zeros((d_model,), jnp.float32),
        )

    def dec_layer_p():
        return dict(
            self=self_attn_p(), cross=cross_attn_p(),
            ln1_g=jnp.ones((d_model,), jnp.float32), ln1_b=jnp.zeros((d_model,), jnp.float32),
            ln2_g=jnp.ones((d_model,), jnp.float32), ln2_b=jnp.zeros((d_model,), jnp.float32),
            w1=w((d_model, d_ff)), b1=jnp.zeros((d_ff,), jnp.float32),
            w2=w((d_ff, d_model)), b2=jnp.zeros((d_model,), jnp.float32),
            ln3_g=jnp.ones((d_model,), jnp.float32), ln3_b=jnp.zeros((d_model,), jnp.float32),
        )

    # nn.Embedding init: uniform(-0.1, 0.1), PAD row zeroed.
    embed = jax.random.uniform(next(keys), (vocab_size, d_model),
                               minval=-0.1, maxval=0.1).astype(jnp.float32)
    embed = embed.at[PAD].set(0.0)

    return dict(
        embed=embed,
        pos=sinusoid_table(max_pos, d_model, PAD),
        enc_layers=[enc_layer_p() for _ in range(n_enc_layers)],
        dec_layers=[dec_layer_p() for _ in range(n_dec_layers)],
        w_out=w((d_model, vocab_size)),
        b_out=jnp.zeros((vocab_size,), jnp.float32),
    )


# ----------------------------------------------------------------------------
# Main
# ----------------------------------------------------------------------------

if __name__ == "__main__":
    VOCAB = 512
    D_MODEL = 128       # multiple of 128 -> exercises the zero-copy QKV slab path
    N_HEADS = 4
    D_FF = 256
    N_ENC = 1
    N_DEC = 2           # >1 layer exercises the "probs only from last layer" path
    BATCH = 2
    SRC_LEN = 8
    BEAM = 5

    key = jax.random.PRNGKey(0)
    k_tok, k_param = jax.random.split(key)

    params = init_params(k_param, VOCAB, D_MODEL, D_FF, N_ENC, N_DEC, max_pos=64)

    src_lens = [8, 6]
    src = jax.random.randint(k_tok, (BATCH, SRC_LEN), 5, VOCAB).astype(jnp.int32)
    src_mask = jnp.stack(
        [(jnp.arange(SRC_LEN) < L).astype(jnp.float32) for L in src_lens]
    )
    src = jnp.where(src_mask > 0, src, PAD).astype(jnp.int32)
    src_oov = src  # no OOV words in this synthetic setup
    max_num_oov = 0

    result_token, final_scores = seq2seq_forward(
        params, src, src_lens, src_oov, max_num_oov, src_mask,
        n_heads=N_HEADS, beam_size=BEAM
    )
    jax.block_until_ready(final_scores)
    assert len(result_token) == BATCH
    print("KERNEL_OK")
</pallas_src>

<mosaic_0001>
module attributes {stable_mosaic.version = 11 : i64} {
  func.func @kernel(%arg0: i32, %arg1: i32, %arg2: i32, %arg3: memref<16x128xf32, #tpu.memory_space<vmem>>, %arg4: memref<128x128xbf16, #tpu.memory_space<vmem>>, %arg5: memref<1x128xf32, #tpu.memory_space<vmem>>, %arg6: memref<16x128xf32, #tpu.memory_space<vmem>>, %arg7: memref<16x128xf32, #tpu.memory_space<vmem>>) attributes {dimension_semantics = [#tpu.dimension_semantics<parallel>, #tpu.dimension_semantics<parallel>, #tpu.dimension_semantics<arbitrary>], iteration_bounds = array<i64: 1, 1, 1>, scalar_prefetch = 0 : i64, scratch_operands = 1 : i64, tpu.core_type = #tpu.core_type<tc>, window_params = [{transform_indices = @transform_0, window_bounds = array<i64: 16, 128>}, {transform_indices = @transform_1, window_bounds = array<i64: 128, 128>}, {transform_indices = @transform_2, window_bounds = array<i64: 1, 128>}, {transform_indices = @transform_3, window_bounds = array<i64: 16, 128>}]} {
    %c0_i32 = arith.constant 0 : i32
    %0 = arith.cmpi eq, %arg2, %c0_i32 : i32
    %1 = arith.extui %0 : i1 to i32
    %c0_i32_0 = arith.constant 0 : i32
    %2 = arith.cmpi ne, %1, %c0_i32_0 : i32
    scf.if %2 {
      %cst_10 = arith.constant 0.000000e+00 : f32
      %13 = vector.broadcast %cst_10 : f32 to vector<16x128xf32>
      %c0_11 = arith.constant 0 : index
      %c0_12 = arith.constant 0 : index
      %14 = vector.load %arg7[%c0_11, %c0_12] : memref<16x128xf32, #tpu.memory_space<vmem>>, vector<16x128xf32>
      tpu.vector_store %arg7[%c0_11, %c0_12], %13 {strides = array<i32>} : memref<16x128xf32, #tpu.memory_space<vmem>>, vector<16x128xf32>,
    } else {
    }
    %c0 = arith.constant 0 : index
    %c0_1 = arith.constant 0 : index
    %3 = vector.load %arg7[%c0, %c0_1] : memref<16x128xf32, #tpu.memory_space<vmem>>, vector<16x128xf32>
    %c0_2 = arith.constant 0 : index
    %c0_3 = arith.constant 0 : index
    %4 = vector.load %arg3[%c0_2, %c0_3] : memref<16x128xf32, #tpu.memory_space<vmem>>, vector<16x128xf32>
    %5 = arith.truncf %4 : vector<16x128xf32> to vector<16x128xbf16>
    %c0_4 = arith.constant 0 : index
    %c0_5 = arith.constant 0 : index
    %6 = vector.load %arg4[%c0_4, %c0_5] : memref<128x128xbf16, #tpu.memory_space<vmem>>, vector<128x128xbf16>
    %cst = arith.constant dense<0.000000e+00> : vector<16x128xf32>
    %7 = tpu.matmul %5, %6, %cst {dimension_numbers = #tpu.dot_dimension_numbers<[1], [0], [0], [1], [0, 0, 1, 1], [], []>} : vector<16x128xbf16>, vector<128x128xbf16>, vector<16x128xf32> -> vector<16x128xf32>
    %8 = arith.addf %3, %7 : vector<16x128xf32>
    %c0_6 = arith.constant 0 : index
    %c0_7 = arith.constant 0 : index
    %9 = vector.load %arg7[%c0_6, %c0_7] : memref<16x128xf32, #tpu.memory_space<vmem>>, vector<16x128xf32>
    tpu.vector_store %arg7[%c0_6, %c0_7], %8 {strides = array<i32>} : memref<16x128xf32, #tpu.memory_space<vmem>>, vector<16x128xf32>,
    %c0_i32_8 = arith.constant 0 : i32
    %10 = arith.cmpi eq, %arg2, %c0_i32_8 : i32
    %11 = arith.extui %10 : i1 to i32
    %c0_i32_9 = arith.constant 0 : i32
    %12 = arith.cmpi ne, %11, %c0_i32_9 : i32
    scf.if %12 {
      %c0_10 = arith.constant 0 : index
      %c0_11 = arith.constant 0 : index
      %13 = vector.load %arg7[%c0_10, %c0_11] : memref<16x128xf32, #tpu.memory_space<vmem>>, vector<16x128xf32>
      %c0_12 = arith.constant 0 : index
      %c0_13 = arith.constant 0 : index
      %14 = vector.load %arg5[%c0_12, %c0_13] : memref<1x128xf32, #tpu.memory_space<vmem>>, vector<1x128xf32>
      %15 = vector.broadcast %14 : vector<1x128xf32> to vector<16x128xf32>
      %16 = arith.addf %13, %15 : vector<16x128xf32>
      %c0_14 = arith.constant 0 : index
      %c0_15 = arith.constant 0 : index
      %17 = vector.load %arg6[%c0_14, %c0_15] : memref<16x128xf32, #tpu.memory_space<vmem>>, vector<16x128xf32>
      tpu.vector_store %arg6[%c0_14, %c0_15], %16 {strides = array<i32>} : memref<16x128xf32, #tpu.memory_space<vmem>>, vector<16x128xf32>,
    } else {
    }
    return
  }
  func.func @transform_0(%arg0: i32, %arg1: i32, %arg2: i32) -> (i32, i32) {
    %c0_i32 = arith.constant 0 : i32
    return %arg0, %arg2 : i32, i32
  }
  func.func @transform_1(%arg0: i32, %arg1: i32, %arg2: i32) -> (i32, i32) {
    %c0_i32 = arith.constant 0 : i32
    return %arg2, %arg1 : i32, i32
  }
  func.func @transform_2(%arg0: i32, %arg1: i32, %arg2: i32) -> (i32, i32) {
    %c0_i32 = arith.constant 0 : i32
    %c0_i32_0 = arith.constant 0 : i32
    return %c0_i32, %arg1 : i32, i32
  }
  func.func @transform_3(%arg0: i32, %arg1: i32, %arg2: i32) -> (i32, i32) {
    %c0_i32 = arith.constant 0 : i32
    return %arg0, %arg1 : i32, i32
  }
}

module attributes {stable_mosaic.version = 11 : i64} {
  func.func @kernel(%arg0: i32, %arg1: i32, %arg2: i32, %arg3: memref<16x128xf32, #tpu.memory_space<vmem>>, %arg4: memref<128x128xbf16, #tpu.memory_space<vmem>>, %arg5: memref<1x128xf32, #tpu.memory_space<vmem>>, %arg6: memref<16x128xf32, #tpu.memory_space<vmem>>, %arg7: memref<16x128xf32, #tpu.memory_space<vmem>>) attributes {dimension_semantics = [#tpu.dimension_semantics<parallel>, #tpu.dimension_semantics<parallel>, #tpu.dimension_semantics<arbitrary>], iteration_bounds = array<i64: 1, 3, 1>, scalar_prefetch = 0 : i64, scratch_operands = 1 : i64, tpu.core_type = #tpu.core_type<tc>, window_params = [{transform_indices = @transform_0, window_bounds = array<i64: 16, 128>}, {transform_indices = @transform_1, window_bounds = array<i64: 128, 128>}, {transform_indices = @transform_2, window_bounds = array<i64: 1, 128>}, {transform_indices = @transform_3, window_bounds = array<i64: 16, 128>}]} {
    %c0_i32 = arith.constant 0 : i32
    %0 = arith.cmpi eq, %arg2, %c0_i32 : i32
    %1 = arith.extui %0 : i1 to i32
    %c0_i32_0 = arith.constant 0 : i32
    %2 = arith.cmpi ne, %1, %c0_i32_0 : i32
    scf.if %2 {
      %cst_10 = arith.constant 0.000000e+00 : f32
      %13 = vector.broadcast %cst_10 : f32 to vector<16x128xf32>
      %c0_11 = arith.constant 0 : index
      %c0_12 = arith.constant 0 : index
      %14 = vector.load %arg7[%c0_11, %c0_12] : memref<16x128xf32, #tpu.memory_space<vmem>>, vector<16x128xf32>
      tpu.vector_store %arg7[%c0_11, %c0_12], %13 {strides = array<i32>} : memref<16x128xf32, #tpu.memory_space<vmem>>, vector<16x128xf32>,
    } else {
    }
    %c0 = arith.constant 0 : index
    %c0_1 = arith.constant 0 : index
    %3 = vector.load %arg7[%c0, %c0_1] : memref<16x128xf32, #tpu.memory_space<vmem>>, vector<16x128xf32>
    %c0_2 = arith.constant 0 : index
    %c0_3 = arith.constant 0 : index
    %4 = vector.load %arg3[%c0_2, %c0_3] : memref<16x128xf32, #tpu.memory_space<vmem>>, vector<16x128xf32>
    %5 = arith.truncf %4 : vector<16x128xf32> to vector<16x128xbf16>
    %c0_4 = arith.constant 0 : index
    %c0_5 = arith.constant 0 : index
    %6 = vector.load %arg4[%c0_4, %c0_5] : memref<128x128xbf16, #tpu.memory_space<vmem>>, vector<128x128xbf16>
    %cst = arith.constant dense<0.000000e+00> : vector<16x128xf32>
    %7 = tpu.matmul %5, %6, %cst {dimension_numbers = #tpu.dot_dimension_numbers<[1], [0], [0], [1], [0, 0, 1, 1], [], []>} : vector<16x128xbf16>, vector<128x128xbf16>, vector<16x128xf32> -> vector<16x128xf32>
    %8 = arith.addf %3, %7 : vector<16x128xf32>
    %c0_6 = arith.constant 0 : index
    %c0_7 = arith.constant 0 : index
    %9 = vector.load %arg7[%c0_6, %c0_7] : memref<16x128xf32, #tpu.memory_space<vmem>>, vector<16x128xf32>
    tpu.vector_store %arg7[%c0_6, %c0_7], %8 {strides = array<i32>} : memref<16x128xf32, #tpu.memory_space<vmem>>, vector<16x128xf32>,
    %c0_i32_8 = arith.constant 0 : i32
    %10 = arith.cmpi eq, %arg2, %c0_i32_8 : i32
    %11 = arith.extui %10 : i1 to i32
    %c0_i32_9 = arith.constant 0 : i32
    %12 = arith.cmpi ne, %11, %c0_i32_9 : i32
    scf.if %12 {
      %c0_10 = arith.constant 0 : index
      %c0_11 = arith.constant 0 : index
      %13 = vector.load %arg7[%c0_10, %c0_11] : memref<16x128xf32, #tpu.memory_space<vmem>>, vector<16x128xf32>
      %c0_12 = arith.constant 0 : index
      %c0_13 = arith.constant 0 : index
      %14 = vector.load %arg5[%c0_12, %c0_13] : memref<1x128xf32, #tpu.memory_space<vmem>>, vector<1x128xf32>
      %15 = vector.broadcast %14 : vector<1x128xf32> to vector<16x128xf32>
      %16 = arith.addf %13, %15 : vector<16x128xf32>
      %c0_14 = arith.constant 0 : index
      %c0_15 = arith.constant 0 : index
      %17 = vector.load %arg6[%c0_14, %c0_15] : memref<16x128xf32, #tpu.memory_space<vmem>>, vector<16x128xf32>
      tpu.vector_store %arg6[%c0_14, %c0_15], %16 {strides = array<i32>} : memref<16x128xf32, #tpu.memory_space<vmem>>, vector<16x128xf32>,
    } else {
    }
    return
  }
  func.func @transform_0(%arg0: i32, %arg1: i32, %arg2: i32) -> (i32, i32) {
    %c0_i32 = arith.constant 0 : i32
    return %arg0, %arg2 : i32, i32
  }
  func.func @transform_1(%arg0: i32, %arg1: i32, %arg2: i32) -> (i32, i32) {
    %c0_i32 = arith.constant 0 : i32
    return %arg2, %arg1 : i32, i32
  }
  func.func @transform_2(%arg0: i32, %arg1: i32, %arg2: i32) -> (i32, i32) {
    %c0_i32 = arith.constant 0 : i32
    %c0_i32_0 = arith.constant 0 : i32
    return %c0_i32, %arg1 : i32, i32
  }
  func.func @transform_3(%arg0: i32, %arg1: i32, %arg2: i32) -> (i32, i32) {
    %c0_i32 = arith.constant 0 : i32
    return %arg0, %arg1 : i32, i32
  }
}

module attributes {stable_mosaic.version = 11 : i64} {
  func.func @kernel(%arg0: i32, %arg1: memref<1x8x128xf32, #tpu.memory_space<vmem>>, %arg2: memref<1x8x128xf32, #tpu.memory_space<vmem>>, %arg3: memref<1x8x128xf32, #tpu.memory_space<vmem>>, %arg4: memref<1x1x8xf32, #tpu.memory_space<vmem>>, %arg5: memref<1x8x128xf32, #tpu.memory_space<vmem>>) attributes {dimension_semantics = [#tpu.dimension_semantics<parallel>], iteration_bounds = array<i64: 2>, scalar_prefetch = 0 : i64, scratch_operands = 0 : i64, tpu.core_type = #tpu.core_type<tc>, window_params = [{transform_indices = @transform_0, window_bounds = array<i64: 1, 8, 128>}, {transform_indices = @transform_1, window_bounds = array<i64: 1, 8, 128>}, {transform_indices = @transform_2, window_bounds = array<i64: 1, 8, 128>}, {transform_indices = @transform_3, window_bounds = array<i64: 1, 1, 8>}, {transform_indices = @transform_4, window_bounds = array<i64: 1, 8, 128>}]} {
    %c0 = arith.constant 0 : index
    %c0_0 = arith.constant 0 : index
    %c0_1 = arith.constant 0 : index
    %0 = vector.load %arg1[%c0, %c0_0, %c0_1] : memref<1x8x128xf32, #tpu.memory_space<vmem>>, vector<1x8x128xf32>
    %1 = vector.shape_cast %0 : vector<1x8x128xf32> to vector<8x128xf32>
    %2 = arith.truncf %1 : vector<8x128xf32> to vector<8x128xbf16>
    %c0_2 = arith.constant 0 : index
    %c0_3 = arith.constant 0 : index
    %c0_4 = arith.constant 0 : index
    %3 = vector.load %arg2[%c0_2, %c0_3, %c0_4] : memref<1x8x128xf32, #tpu.memory_space<vmem>>, vector<1x8x128xf32>
    %4 = vector.shape_cast %3 : vector<1x8x128xf32> to vector<8x128xf32>
    %5 = arith.truncf %4 : vector<8x128xf32> to vector<8x128xbf16>
    %c0_5 = arith.constant 0 : index
    %c0_6 = arith.constant 0 : index
    %c0_7 = arith.constant 0 : index
    %6 = vector.load %arg3[%c0_5, %c0_6, %c0_7] : memref<1x8x128xf32, #tpu.memory_space<vmem>>, vector<1x8x128xf32>
    %7 = vector.shape_cast %6 : vector<1x8x128xf32> to vector<8x128xf32>
    %8 = arith.truncf %7 : vector<8x128xf32> to vector<8x128xbf16>
    %c0_8 = arith.constant 0 : index
    %c0_9 = arith.constant 0 : index
    %c0_10 = arith.constant 0 : index
    %9 = vector.load %arg4[%c0_8, %c0_9, %c0_10] : memref<1x1x8xf32, #tpu.memory_space<vmem>>, vector<1x1x8xf32>
    %10 = vector.shape_cast %9 : vector<1x1x8xf32> to vector<1x8xf32>
    %cst = arith.constant 1.000000e+00 : f32
    %11 = vector.broadcast %cst : f32 to vector<1x8xf32>
    %12 = arith.subf %11, %10 : vector<1x8xf32>
    %cst_11 = arith.constant -1.000000e+09 : f32
    %13 = vector.broadcast %cst_11 : f32 to vector<1x8xf32>
    %14 = arith.mulf %12, %13 : vector<1x8xf32>
    %15 = vector.extract_strided_slice %2 {offsets = [0, 0], sizes = [8, 32], strides = [1, 1]} : vector<8x128xbf16> to vector<8x32xbf16>
    %16 = vector.extract_strided_slice %5 {offsets = [0, 0], sizes = [8, 32], strides = [1, 1]} : vector<8x128xbf16> to vector<8x32xbf16>
    %17 = vector.extract_strided_slice %8 {offsets = [0, 0], sizes = [8, 32], strides = [1, 1]} : vector<8x128xbf16> to vector<8x32xbf16>
    %cst_12 = arith.constant dense<0.000000e+00> : vector<8x8xf32>
    %18 = tpu.matmul %15, %16, %cst_12 {dimension_numbers = #tpu.dot_dimension_numbers<[1], [1], [0], [0], [0, 0, 1, 0], [], []>} : vector<8x32xbf16>, vector<8x32xbf16>, vector<8x8xf32> -> vector<8x8xf32>
    %cst_13 = arith.constant 0.176776692 : f32
    %19 = vector.broadcast %cst_13 : f32 to vector<8x8xf32>
    %20 = arith.mulf %18, %19 : vector<8x8xf32>
    %21 = vector.broadcast %14 : vector<1x8xf32> to vector<8x8xf32>
    %22 = arith.addf %20, %21 : vector<8x8xf32>
    %cst_14 = arith.constant dense<0xFF800000> : vector<8xf32>
    %23 = vector.multi_reduction <maximumf>, %22, %cst_14 [1] : vector<8x8xf32> to vector<8xf32>
    %24 = vector.shape_cast %23 : vector<8xf32> to vector<8x1xf32>
    %25 = vector.broadcast %24 : vector<8x1xf32> to vector<8x8xf32>
    %26 = arith.subf %22, %25 : vector<8x8xf32>
    %27 = math.exp %26 : vector<8x8xf32>
    %cst_15 = arith.constant dense<0.000000e+00> : vector<8xf32>
    %28 = vector.multi_reduction <add>, %27, %cst_15 [1] : vector<8x8xf32> to vector<8xf32>
    %29 = vector.shape_cast %28 : vector<8xf32> to vector<8x1xf32>
    %30 = tpu.reciprocal %29 {approx = true} : vector<8x1xf32> -> vector<8x1xf32>
    %31 = vector.broadcast %30 : vector<8x1xf32> to vector<8x8xf32>
    %32 = arith.mulf %27, %31 : vector<8x8xf32>
    %33 = arith.truncf %32 : vector<8x8xf32> to vector<8x8xbf16>
    %cst_16 = arith.constant dense<0.000000e+00> : vector<8x32xf32>
    %34 = tpu.matmul %33, %17, %cst_16 {dimension_numbers = #tpu.dot_dimension_numbers<[1], [0], [0], [1], [0, 0, 1, 1], [], []>} : vector<8x8xbf16>, vector<8x32xbf16>, vector<8x32xf32> -> vector<8x32xf32>
    %c0_17 = arith.constant 0 : index
    %c0_18 = arith.constant 0 : index
    %c0_19 = arith.constant 0 : index
    %35 = vector.load %arg5[%c0_17, %c0_18, %c0_19] : memref<1x8x128xf32, #tpu.memory_space<vmem>>, vector<1x8x32xf32>
    %36 = vector.shape_cast %35 : vector<1x8x32xf32> to vector<8x32xf32>
    %37 = vector.shape_cast %34 : vector<8x32xf32> to vector<1x8x32xf32>
    tpu.vector_store %arg5[%c0_17, %c0_18, %c0_19], %37 {strides = array<i32>} : memref<1x8x128xf32, #tpu.memory_space<vmem>>, vector<1x8x32xf32>,
    %38 = vector.extract_strided_slice %2 {offsets = [0, 32], sizes = [8, 32], strides = [1, 1]} : vector<8x128xbf16> to vector<8x32xbf16>
    %39 = vector.extract_strided_slice %5 {offsets = [0, 32], sizes = [8, 32], strides = [1, 1]} : vector<8x128xbf16> to vector<8x32xbf16>
    %40 = vector.extract_strided_slice %8 {offsets = [0, 32], sizes = [8, 32], strides = [1, 1]} : vector<8x128xbf16> to vector<8x32xbf16>
    %cst_20 = arith.constant dense<0.000000e+00> : vector<8x8xf32>
    %41 = tpu.matmul %38, %39, %cst_20 {dimension_numbers = #tpu.dot_dimension_numbers<[1], [1], [0], [0], [0, 0, 1, 0], [], []>} : vector<8x32xbf16>, vector<8x32xbf16>, vector<8x8xf32> -> vector<8x8xf32>
    %cst_21 = arith.constant 0.176776692 : f32
    %42 = vector.broadcast %cst_21 : f32 to vector<8x8xf32>
    %43 = arith.mulf %41, %42 : vector<8x8xf32>
    %44 = vector.broadcast %14 : vector<1x8xf32> to vector<8x8xf32>
    %45 = arith.addf %43, %44 : vector<8x8xf32>
    %cst_22 = arith.constant dense<0xFF800000> : vector<8xf32>
    %46 = vector.multi_reduction <maximumf>, %45, %cst_22 [1] : vector<8x8xf32> to vector<8xf32>
    %47 = vector.shape_cast %46 : vector<8xf32> to vector<8x1xf32>
    %48 = vector.broadcast %47 : vector<8x1xf32> to vector<8x8xf32>
    %49 = arith.subf %45, %48 : vector<8x8xf32>
    %50 = math.exp %49 : vector<8x8xf32>
    %cst_23 = arith.constant dense<0.000000e+00> : vector<8xf32>
    %51 = vector.multi_reduction <add>, %50, %cst_23 [1] : vector<8x8xf32> to vector<8xf32>
    %52 = vector.shape_cast %51 : vector<8xf32> to vector<8x1xf32>
    %53 = tpu.reciprocal %52 {approx = true} : vector<8x1xf32> -> vector<8x1xf32>
    %54 = vector.broadcast %53 : vector<8x1xf32> to vector<8x8xf32>
    %55 = arith.mulf %50, %54 : vector<8x8xf32>
    %56 = arith.truncf %55 : vector<8x8xf32> to vector<8x8xbf16>
    %cst_24 = arith.constant dense<0.000000e+00> : vector<8x32xf32>
    %57 = tpu.matmul %56, %40, %cst_24 {dimension_numbers = #tpu.dot_dimension_numbers<[1], [0], [0], [1], [0, 0, 1, 1], [], []>} : vector<8x8xbf16>, vector<8x32xbf16>, vector<8x32xf32> -> vector<8x32xf32>
    %c0_25 = arith.constant 0 : index
    %c0_26 = arith.constant 0 : index
    %c32 = arith.constant 32 : index
    %58 = vector.load %arg5[%c0_25, %c0_26, %c32] : memref<1x8x128xf32, #tpu.memory_space<vmem>>, vector<1x8x32xf32>
    %59 = vector.shape_cast %58 : vector<1x8x32xf32> to vector<8x32xf32>
    %60 = vector.shape_cast %57 : vector<8x32xf32> to vector<1x8x32xf32>
    tpu.vector_store %arg5[%c0_25, %c0_26, %c32], %60 {strides = array<i32>} : memref<1x8x128xf32, #tpu.memory_space<vmem>>, vector<1x8x32xf32>,
    %61 = vector.extract_strided_slice %2 {offsets = [0, 64], sizes = [8, 32], strides = [1, 1]} : vector<8x128xbf16> to vector<8x32xbf16>
    %62 = vector.extract_strided_slice %5 {offsets = [0, 64], sizes = [8, 32], strides = [1, 1]} : vector<8x128xbf16> to vector<8x32xbf16>
    %63 = vector.extract_strided_slice %8 {offsets = [0, 64], sizes = [8, 32], strides = [1, 1]} : vector<8x128xbf16> to vector<8x32xbf16>
    %cst_27 = arith.constant dense<0.000000e+00> : vector<8x8xf32>
    %64 = tpu.matmul %61, %62, %cst_27 {dimension_numbers = #tpu.dot_dimension_numbers<[1], [1], [0], [0], [0, 0, 1, 0], [], []>} : vector<8x32xbf16>, vector<8x32xbf16>, vector<8x8xf32> -> vector<8x8xf32>
    %cst_28 = arith.constant 0.176776692 : f32
    %65 = vector.broadcast %cst_28 : f32 to vector<8x8xf32>
    %66 = arith.mulf %64, %65 : vector<8x8xf32>
    %67 = vector.broadcast %14 : vector<1x8xf32> to vector<8x8xf32>
    %68 = arith.addf %66, %67 : vector<8x8xf32>
    %cst_29 = arith.constant dense<0xFF800000> : vector<8xf32>
    %69 = vector.multi_reduction <maximumf>, %68, %cst_29 [1] : vector<8x8xf32> to vector<8xf32>
    %70 = vector.shape_cast %69 : vector<8xf32> to vector<8x1xf32>
    %71 = vector.broadcast %70 : vector<8x1xf32> to vector<8x8xf32>
    %72 = arith.subf %68, %71 : vector<8x8xf32>
    %73 = math.exp %72 : vector<8x8xf32>
    %cst_30 = arith.constant dense<0.000000e+00> : vector<8xf32>
    %74 = vector.multi_reduction <add>, %73, %cst_30 [1] : vector<8x8xf32> to vector<8xf32>
    %75 = vector.shape_cast %74 : vector<8xf32> to vector<8x1xf32>
    %76 = tpu.reciprocal %75 {approx = true} : vector<8x1xf32> -> vector<8x1xf32>
    %77 = vector.broadcast %76 : vector<8x1xf32> to vector<8x8xf32>
    %78 = arith.mulf %73, %77 : vector<8x8xf32>
    %79 = arith.truncf %78 : vector<8x8xf32> to vector<8x8xbf16>
    %cst_31 = arith.constant dense<0.000000e+00> : vector<8x32xf32>
    %80 = tpu.matmul %79, %63, %cst_31 {dimension_numbers = #tpu.dot_dimension_numbers<[1], [0], [0], [1], [0, 0, 1, 1], [], []>} : vector<8x8xbf16>, vector<8x32xbf16>, vector<8x32xf32> -> vector<8x32xf32>
    %c0_32 = arith.constant 0 : index
    %c0_33 = arith.constant 0 : index
    %c64 = arith.constant 64 : index
    %81 = vector.load %arg5[%c0_32, %c0_33, %c64] : memref<1x8x128xf32, #tpu.memory_space<vmem>>, vector<1x8x32xf32>
    %82 = vector.shape_cast %81 : vector<1x8x32xf32> to vector<8x32xf32>
    %83 = vector.shape_cast %80 : vector<8x32xf32> to vector<1x8x32xf32>
    tpu.vector_store %arg5[%c0_32, %c0_33, %c64], %83 {strides = array<i32>} : memref<1x8x128xf32, #tpu.memory_space<vmem>>, vector<1x8x32xf32>,
    %84 = vector.extract_strided_slice %2 {offsets = [0, 96], sizes = [8, 32], strides = [1, 1]} : vector<8x128xbf16> to vector<8x32xbf16>
    %85 = vector.extract_strided_slice %5 {offsets = [0, 96], sizes = [8, 32], strides = [1, 1]} : vector<8x128xbf16> to vector<8x32xbf16>
    %86 = vector.extract_strided_slice %8 {offsets = [0, 96], sizes = [8, 32], strides = [1, 1]} : vector<8x128xbf16> to vector<8x32xbf16>
    %cst_34 = arith.constant dense<0.000000e+00> : vector<8x8xf32>
    %87 = tpu.matmul %84, %85, %cst_34 {dimension_numbers = #tpu.dot_dimension_numbers<[1], [1], [0], [0], [0, 0, 1, 0], [], []>} : vector<8x32xbf16>, vector<8x32xbf16>, vector<8x8xf32> -> vector<8x8xf32>
    %cst_35 = arith.constant 0.176776692 : f32
    %88 = vector.broadcast %cst_35 : f32 to vector<8x8xf32>
    %89 = arith.mulf %87, %88 : vector<8x8xf32>
    %90 = vector.broadcast %14 : vector<1x8xf32> to vector<8x8xf32>
    %91 = arith.addf %89, %90 : vector<8x8xf32>
    %cst_36 = arith.constant dense<0xFF800000> : vector<8xf32>
    %92 = vector.multi_reduction <maximumf>, %91, %cst_36 [1] : vector<8x8xf32> to vector<8xf32>
    %93 = vector.shape_cast %92 : vector<8xf32> to vector<8x1xf32>
    %94 = vector.broadcast %93 : vector<8x1xf32> to vector<8x8xf32>
    %95 = arith.subf %91, %94 : vector<8x8xf32>
    %96 = math.exp %95 : vector<8x8xf32>
    %cst_37 = arith.constant dense<0.000000e+00> : vector<8xf32>
    %97 = vector.multi_reduction <add>, %96, %cst_37 [1] : vector<8x8xf32> to vector<8xf32>
    %98 = vector.shape_cast %97 : vector<8xf32> to vector<8x1xf32>
    %99 = tpu.reciprocal %98 {approx = true} : vector<8x1xf32> -> vector<8x1xf32>
    %100 = vector.broadcast %99 : vector<8x1xf32> to vector<8x8xf32>
    %101 = arith.mulf %96, %100 : vector<8x8xf32>
    %102 = arith.truncf %101 : vector<8x8xf32> to vector<8x8xbf16>
    %cst_38 = arith.constant dense<0.000000e+00> : vector<8x32xf32>
    %103 = tpu.matmul %102, %86, %cst_38 {dimension_numbers = #tpu.dot_dimension_numbers<[1], [0], [0], [1], [0, 0, 1, 1], [], []>} : vector<8x8xbf16>, vector<8x32xbf16>, vector<8x32xf32> -> vector<8x32xf32>
    %c0_39 = arith.constant 0 : index
    %c0_40 = arith.constant 0 : index
    %c96 = arith.constant 96 : index
    %104 = vector.load %arg5[%c0_39, %c0_40, %c96] : memref<1x8x128xf32, #tpu.memory_space<vmem>>, vector<1x8x32xf32>
    %105 = vector.shape_cast %104 : vector<1x8x32xf32> to vector<8x32xf32>
    %106 = vector.shape_cast %103 : vector<8x32xf32> to vector<1x8x32xf32>
    tpu.vector_store %arg5[%c0_39, %c0_40, %c96], %106 {strides = array<i32>} : memref<1x8x128xf32, #tpu.memory_space<vmem>>, vector<1x8x32xf32>,
    return
  }
  func.func @transform_0(%arg0: i32) -> (i32, i32, i32) {
    %c0_i32 = arith.constant 0 : i32
    %c0_i32_0 = arith.constant 0 : i32
    %c0_i32_1 = arith.constant 0 : i32
    return %arg0, %c0_i32, %c0_i32_0 : i32, i32, i32
  }
  func.func @transform_1(%arg0: i32) -> (i32, i32, i32) {
    %c2_i32 = arith.constant 2 : i32
    %c0_i32 = arith.constant 0 : i32
    %0 = arith.cmpi eq, %c2_i32, %c0_i32 : i32
    %c1_i32 = arith.constant 1 : i32
    %1 = arith.select %0, %c1_i32, %c2_i32 : i32
    %2 = arith.remsi %arg0, %1 : i32
    %c0_i32_0 = arith.constant 0 : i32
    %3 = arith.cmpi ne, %2, %c0_i32_0 : i32
    %c0_i32_1 = arith.constant 0 : i32
    %4 = arith.cmpi slt, %2, %c0_i32_1 : i32
    %c0_i32_2 = arith.constant 0 : i32
    %5 = arith.cmpi slt, %1, %c0_i32_2 : i32
    %6 = arith.xori %4, %5 : i1
    %7 = arith.andi %6, %3 : i1
    %8 = arith.addi %2, %1 : i32
    %9 = arith.select %7, %8, %2 : i32
    %c0_i32_3 = arith.constant 0 : i32
    %c1_i32_4 = arith.constant 1 : i32
    %c0_i32_5 = arith.constant 0 : i32
    return %9, %c0_i32_3, %c1_i32_4 : i32, i32, i32
  }
  func.func @transform_2(%arg0: i32) -> (i32, i32, i32) {
    %c2_i32 = arith.constant 2 : i32
    %c0_i32 = arith.constant 0 : i32
    %0 = arith.cmpi eq, %c2_i32, %c0_i32 : i32
    %c1_i32 = arith.constant 1 : i32
    %1 = arith.select %0, %c1_i32, %c2_i32 : i32
    %2 = arith.remsi %arg0, %1 : i32
    %c0_i32_0 = arith.constant 0 : i32
    %3 = arith.cmpi ne, %2, %c0_i32_0 : i32
    %c0_i32_1 = arith.constant 0 : i32
    %4 = arith.cmpi slt, %2, %c0_i32_1 : i32
    %c0_i32_2 = arith.constant 0 : i32
    %5 = arith.cmpi slt, %1, %c0_i32_2 : i32
    %6 = arith.xori %4, %5 : i1
    %7 = arith.andi %6, %3 : i1
    %8 = arith.addi %2, %1 : i32
    %9 = arith.select %7, %8, %2 : i32
    %c0_i32_3 = arith.constant 0 : i32
    %c2_i32_4 = arith.constant 2 : i32
    %c0_i32_5 = arith.constant 0 : i32
    return %9, %c0_i32_3, %c2_i32_4 : i32, i32, i32
  }
  func.func @transform_3(%arg0: i32) -> (i32, i32, i32) {
    %c2_i32 = arith.constant 2 : i32
    %c0_i32 = arith.constant 0 : i32
    %0 = arith.cmpi eq, %c2_i32, %c0_i32 : i32
    %c1_i32 = arith.constant 1 : i32
    %1 = arith.select %0, %c1_i32, %c2_i32 : i32
    %2 = arith.remsi %arg0, %1 : i32
    %c0_i32_0 = arith.constant 0 : i32
    %3 = arith.cmpi ne, %2, %c0_i32_0 : i32
    %c0_i32_1 = arith.constant 0 : i32
    %4 = arith.cmpi slt, %2, %c0_i32_1 : i32
    %c0_i32_2 = arith.constant 0 : i32
    %5 = arith.cmpi slt, %1, %c0_i32_2 : i32
    %6 = arith.xori %4, %5 : i1
    %7 = arith.andi %6, %3 : i1
    %8 = arith.addi %2, %1 : i32
    %9 = arith.select %7, %8, %2 : i32
    %c0_i32_3 = arith.constant 0 : i32
    %c0_i32_4 = arith.constant 0 : i32
    %c0_i32_5 = arith.constant 0 : i32
    return %9, %c0_i32_3, %c0_i32_4 : i32, i32, i32
  }
  func.func @transform_4(%arg0: i32) -> (i32, i32, i32) {
    %c0_i32 = arith.constant 0 : i32
    %c0_i32_0 = arith.constant 0 : i32
    %c0_i32_1 = arith.constant 0 : i32
    return %arg0, %c0_i32, %c0_i32_0 : i32, i32, i32
  }
}

module attributes {stable_mosaic.version = 11 : i64} {
  func.func @kernel(%arg0: i32, %arg1: memref<16x128xf32, #tpu.memory_space<vmem>>, %arg2: memref<16x128xf32, #tpu.memory_space<vmem>>, %arg3: memref<1x128xf32, #tpu.memory_space<vmem>>, %arg4: memref<1x128xf32, #tpu.memory_space<vmem>>, %arg5: memref<16x128xf32, #tpu.memory_space<vmem>>) attributes {dimension_semantics = [#tpu.dimension_semantics<parallel>], iteration_bounds = array<i64: 1>, scalar_prefetch = 0 : i64, scratch_operands = 0 : i64, tpu.core_type = #tpu.core_type<tc>, window_params = [{transform_indices = @transform_0, window_bounds = array<i64: 16, 128>}, {transform_indices = @transform_1, window_bounds = array<i64: 16, 128>}, {pipeline_mode = #tpu.pipeline_mode<synchronous>, transform_indices = @transform_2, window_bounds = array<i64: 1, 128>}, {pipeline_mode = #tpu.pipeline_mode<synchronous>, transform_indices = @transform_3, window_bounds = array<i64: 1, 128>}, {transform_indices = @transform_4, window_bounds = array<i64: 16, 128>}]} {
    %c0 = arith.constant 0 : index
    %c0_0 = arith.constant 0 : index
    %0 = vector.load %arg1[%c0, %c0_0] : memref<16x128xf32, #tpu.memory_space<vmem>>, vector<16x128xf32>
    %c0_1 = arith.constant 0 : index
    %c0_2 = arith.constant 0 : index
    %1 = vector.load %arg2[%c0_1, %c0_2] : memref<16x128xf32, #tpu.memory_space<vmem>>, vector<16x128xf32>
    %2 = arith.addf %0, %1 : vector<16x128xf32>
    %cst = arith.constant dense<0.000000e+00> : vector<16xf32>
    %3 = vector.multi_reduction <add>, %2, %cst [1] : vector<16x128xf32> to vector<16xf32>
    %4 = vector.shape_cast %3 : vector<16xf32> to vector<16x1xf32>
    %cst_3 = arith.constant 1.280000e+02 : f32
    %5 = vector.broadcast %cst_3 : f32 to vector<16x1xf32>
    %6 = arith.divf %4, %5 : vector<16x1xf32>
    %7 = vector.broadcast %6 : vector<16x1xf32> to vector<16x128xf32>
    %8 = arith.subf %2, %7 : vector<16x128xf32>
    %9 = arith.mulf %8, %8 : vector<16x128xf32>
    %cst_4 = arith.constant dense<0.000000e+00> : vector<16xf32>
    %10 = vector.multi_reduction <add>, %9, %cst_4 [1] : vector<16x128xf32> to vector<16xf32>
    %11 = vector.shape_cast %10 : vector<16xf32> to vector<16x1xf32>
    %cst_5 = arith.constant 1.280000e+02 : f32
    %12 = vector.broadcast %cst_5 : f32 to vector<16x1xf32>
    %13 = arith.divf %11, %12 : vector<16x1xf32>
    %14 = vector.broadcast %6 : vector<16x1xf32> to vector<16x128xf32>
    %15 = arith.subf %2, %14 : vector<16x128xf32>
    %cst_6 = arith.constant 9.99999974E-6 : f32
    %16 = vector.broadcast %cst_6 : f32 to vector<16x1xf32>
    %17 = arith.addf %13, %16 : vector<16x1xf32>
    %18 = math.rsqrt %17 : vector<16x1xf32>
    %19 = vector.broadcast %18 : vector<16x1xf32> to vector<16x128xf32>
    %20 = arith.mulf %15, %19 : vector<16x128xf32>
    %c0_7 = arith.constant 0 : index
    %c0_8 = arith.constant 0 : index
    %21 = vector.load %arg3[%c0_7, %c0_8] : memref<1x128xf32, #tpu.memory_space<vmem>>, vector<1x128xf32>
    %22 = vector.broadcast %21 : vector<1x128xf32> to vector<16x128xf32>
    %23 = arith.mulf %20, %22 : vector<16x128xf32>
    %c0_9 = arith.constant 0 : index
    %c0_10 = arith.constant 0 : index
    %24 = vector.load %arg4[%c0_9, %c0_10] : memref<1x128xf32, #tpu.memory_space<vmem>>, vector<1x128xf32>
    %25 = vector.broadcast %24 : vector<1x128xf32> to vector<16x128xf32>
    %26 = arith.addf %23, %25 : vector<16x128xf32>
    %c0_11 = arith.constant 0 : index
    %c0_12 = arith.constant 0 : index
    %27 = vector.load %arg5[%c0_11, %c0_12] : memref<16x128xf32, #tpu.memory_space<vmem>>, vector<16x128xf32>
    tpu.vector_store %arg5[%c0_11, %c0_12], %26 {strides = array<i32>} : memref<16x128xf32, #tpu.memory_space<vmem>>, vector<16x128xf32>,
    return
  }
  func.func @transform_0(%arg0: i32) -> (i32, i32) {
    %c0_i32 = arith.constant 0 : i32
    %c0_i32_0 = arith.constant 0 : i32
    return %arg0, %c0_i32 : i32, i32
  }
  func.func @transform_1(%arg0: i32) -> (i32, i32) {
    %c0_i32 = arith.constant 0 : i32
    %c0_i32_0 = arith.constant 0 : i32
    return %arg0, %c0_i32 : i32, i32
  }
  func.func @transform_2(%arg0: i32) -> (i32, i32) {
    %c0_i32 = arith.constant 0 : i32
    %c0_i32_0 = arith.constant 0 : i32
    %c0_i32_1 = arith.constant 0 : i32
    return %c0_i32, %c0_i32_0 : i32, i32
  }
  func.func @transform_3(%arg0: i32) -> (i32, i32) {
    %c0_i32 = arith.constant 0 : i32
    %c0_i32_0 = arith.constant 0 : i32
    %c0_i32_1 = arith.constant 0 : i32
    return %c0_i32, %c0_i32_0 : i32, i32
  }
  func.func @transform_4(%arg0: i32) -> (i32, i32) {
    %c0_i32 = arith.constant 0 : i32
    %c0_i32_0 = arith.constant 0 : i32
    return %arg0, %c0_i32 : i32, i32
  }
}

module attributes {stable_mosaic.version = 11 : i64} {
  func.func @kernel(%arg0: i32, %arg1: i32, %arg2: i32, %arg3: memref<16x128xf32, #tpu.memory_space<vmem>>, %arg4: memref<128x256xbf16, #tpu.memory_space<vmem>>, %arg5: memref<1x256xf32, #tpu.memory_space<vmem>>, %arg6: memref<16x256xf32, #tpu.memory_space<vmem>>, %arg7: memref<16x256xf32, #tpu.memory_space<vmem>>) attributes {dimension_semantics = [#tpu.dimension_semantics<parallel>, #tpu.dimension_semantics<parallel>, #tpu.dimension_semantics<arbitrary>], iteration_bounds = array<i64: 1, 1, 1>, scalar_prefetch = 0 : i64, scratch_operands = 1 : i64, tpu.core_type = #tpu.core_type<tc>, window_params = [{transform_indices = @transform_0, window_bounds = array<i64: 16, 128>}, {transform_indices = @transform_1, window_bounds = array<i64: 128, 256>}, {transform_indices = @transform_2, window_bounds = array<i64: 1, 256>}, {transform_indices = @transform_3, window_bounds = array<i64: 16, 256>}]} {
    %c0_i32 = arith.constant 0 : i32
    %0 = arith.cmpi eq, %arg2, %c0_i32 : i32
    %1 = arith.extui %0 : i1 to i32
    %c0_i32_0 = arith.constant 0 : i32
    %2 = arith.cmpi ne, %1, %c0_i32_0 : i32
    scf.if %2 {
      %cst_10 = arith.constant 0.000000e+00 : f32
      %13 = vector.broadcast %cst_10 : f32 to vector<16x256xf32>
      %c0_11 = arith.constant 0 : index
      %c0_12 = arith.constant 0 : index
      %14 = vector.load %arg7[%c0_11, %c0_12] : memref<16x256xf32, #tpu.memory_space<vmem>>, vector<16x256xf32>
      tpu.vector_store %arg7[%c0_11, %c0_12], %13 {strides = array<i32>} : memref<16x256xf32, #tpu.memory_space<vmem>>, vector<16x256xf32>,
    } else {
    }
    %c0 = arith.constant 0 : index
    %c0_1 = arith.constant 0 : index
    %3 = vector.load %arg7[%c0, %c0_1] : memref<16x256xf32, #tpu.memory_space<vmem>>, vector<16x256xf32>
    %c0_2 = arith.constant 0 : index
    %c0_3 = arith.constant 0 : index
    %4 = vector.load %arg3[%c0_2, %c0_3] : memref<16x128xf32, #tpu.memory_space<vmem>>, vector<16x128xf32>
    %5 = arith.truncf %4 : vector<16x128xf32> to vector<16x128xbf16>
    %c0_4 = arith.constant 0 : index
    %c0_5 = arith.constant 0 : index
    %6 = vector.load %arg4[%c0_4, %c0_5] : memref<128x256xbf16, #tpu.memory_space<vmem>>, vector<128x256xbf16>
    %cst = arith.constant dense<0.000000e+00> : vector<16x256xf32>
    %7 = tpu.matmul %5, %6, %cst {dimension_numbers = #tpu.dot_dimension_numbers<[1], [0], [0], [1], [0, 0, 1, 1], [], []>} : vector<16x128xbf16>, vector<128x256xbf16>, vector<16x256xf32> -> vector<16x256xf32>
    %8 = arith.addf %3, %7 : vector<16x256xf32>
    %c0_6 = arith.constant 0 : index
    %c0_7 = arith.constant 0 : index
    %9 = vector.load %arg7[%c0_6, %c0_7] : memref<16x256xf32, #tpu.memory_space<vmem>>, vector<16x256xf32>
    tpu.vector_store %arg7[%c0_6, %c0_7], %8 {strides = array<i32>} : memref<16x256xf32, #tpu.memory_space<vmem>>, vector<16x256xf32>,
    %c0_i32_8 = arith.constant 0 : i32
    %10 = arith.cmpi eq, %arg2, %c0_i32_8 : i32
    %11 = arith.extui %10 : i1 to i32
    %c0_i32_9 = arith.constant 0 : i32
    %12 = arith.cmpi ne, %11, %c0_i32_9 : i32
    scf.if %12 {
      %c0_10 = arith.constant 0 : index
      %c0_11 = arith.constant 0 : index
      %13 = vector.load %arg7[%c0_10, %c0_11] : memref<16x256xf32, #tpu.memory_space<vmem>>, vector<16x256xf32>
      %c0_12 = arith.constant 0 : index
      %c0_13 = arith.constant 0 : index
      %14 = vector.load %arg5[%c0_12, %c0_13] : memref<1x256xf32, #tpu.memory_space<vmem>>, vector<1x256xf32>
      %15 = vector.broadcast %14 : vector<1x256xf32> to vector<16x256xf32>
      %16 = arith.addf %13, %15 : vector<16x256xf32>
      %cst_14 = arith.constant 0.000000e+00 : f32
      %17 = vector.broadcast %cst_14 : f32 to vector<16x256xf32>
      %18 = arith.maximumf %16, %17 : vector<16x256xf32>
      %c0_15 = arith.constant 0 : index
      %c0_16 = arith.constant 0 : index
      %19 = vector.load %arg6[%c0_15, %c0_16] : memref<16x256xf32, #tpu.memory_space<vmem>>, vector<16x256xf32>
      tpu.vector_store %arg6[%c0_15, %c0_16], %18 {strides = array<i32>} : memref<16x256xf32, #tpu.memory_space<vmem>>, vector<16x256xf32>,
    } else {
    }
    return
  }
  func.func @transform_0(%arg0: i32, %arg1: i32, %arg2: i32) -> (i32, i32) {
    %c0_i32 = arith.constant 0 : i32
    return %arg0, %arg2 : i32, i32
  }
  func.func @transform_1(%arg0: i32, %arg1: i32, %arg2: i32) -> (i32, i32) {
    %c0_i32 = arith.constant 0 : i32
    return %arg2, %arg1 : i32, i32
  }
  func.func @transform_2(%arg0: i32, %arg1: i32, %arg2: i32) -> (i32, i32) {
    %c0_i32 = arith.constant 0 : i32
    %c0_i32_0 = arith.constant 0 : i32
    return %c0_i32, %arg1 : i32, i32
  }
  func.func @transform_3(%arg0: i32, %arg1: i32, %arg2: i32) -> (i32, i32) {
    %c0_i32 = arith.constant 0 : i32
    return %arg0, %arg1 : i32, i32
  }
}

module attributes {stable_mosaic.version = 11 : i64} {
  func.func @kernel(%arg0: i32, %arg1: i32, %arg2: i32, %arg3: memref<16x256xf32, #tpu.memory_space<vmem>>, %arg4: memref<256x128xbf16, #tpu.memory_space<vmem>>, %arg5: memref<1x128xf32, #tpu.memory_space<vmem>>, %arg6: memref<16x128xf32, #tpu.memory_space<vmem>>, %arg7: memref<16x128xf32, #tpu.memory_space<vmem>>) attributes {dimension_semantics = [#tpu.dimension_semantics<parallel>, #tpu.dimension_semantics<parallel>, #tpu.dimension_semantics<arbitrary>], iteration_bounds = array<i64: 1, 1, 1>, scalar_prefetch = 0 : i64, scratch_operands = 1 : i64, tpu.core_type = #tpu.core_type<tc>, window_params = [{transform_indices = @transform_0, window_bounds = array<i64: 16, 256>}, {transform_indices = @transform_1, window_bounds = array<i64: 256, 128>}, {transform_indices = @transform_2, window_bounds = array<i64: 1, 128>}, {transform_indices = @transform_3, window_bounds = array<i64: 16, 128>}]} {
    %c0_i32 = arith.constant 0 : i32
    %0 = arith.cmpi eq, %arg2, %c0_i32 : i32
    %1 = arith.extui %0 : i1 to i32
    %c0_i32_0 = arith.constant 0 : i32
    %2 = arith.cmpi ne, %1, %c0_i32_0 : i32
    scf.if %2 {
      %cst_10 = arith.constant 0.000000e+00 : f32
      %13 = vector.broadcast %cst_10 : f32 to vector<16x128xf32>
      %c0_11 = arith.constant 0 : index
      %c0_12 = arith.constant 0 : index
      %14 = vector.load %arg7[%c0_11, %c0_12] : memref<16x128xf32, #tpu.memory_space<vmem>>, vector<16x128xf32>
      tpu.vector_store %arg7[%c0_11, %c0_12], %13 {strides = array<i32>} : memref<16x128xf32, #tpu.memory_space<vmem>>, vector<16x128xf32>,
    } else {
    }
    %c0 = arith.constant 0 : index
    %c0_1 = arith.constant 0 : index
    %3 = vector.load %arg7[%c0, %c0_1] : memref<16x128xf32, #tpu.memory_space<vmem>>, vector<16x128xf32>
    %c0_2 = arith.constant 0 : index
    %c0_3 = arith.constant 0 : index
    %4 = vector.load %arg3[%c0_2, %c0_3] : memref<16x256xf32, #tpu.memory_space<vmem>>, vector<16x256xf32>
    %5 = arith.truncf %4 : vector<16x256xf32> to vector<16x256xbf16>
    %c0_4 = arith.constant 0 : index
    %c0_5 = arith.constant 0 : index
    %6 = vector.load %arg4[%c0_4, %c0_5] : memref<256x128xbf16, #tpu.memory_space<vmem>>, vector<256x128xbf16>
    %cst = arith.constant dense<0.000000e+00> : vector<16x128xf32>
    %7 = tpu.matmul %5, %6, %cst {dimension_numbers = #tpu.dot_dimension_numbers<[1], [0], [0], [1], [0, 0, 1, 1], [], []>} : vector<16x256xbf16>, vector<256x128xbf16>, vector<16x128xf32> -> vector<16x128xf32>
    %8 = arith.addf %3, %7 : vector<16x128xf32>
    %c0_6 = arith.constant 0 : index
    %c0_7 = arith.constant 0 : index
    %9 = vector.load %arg7[%c0_6, %c0_7] : memref<16x128xf32, #tpu.memory_space<vmem>>, vector<16x128xf32>
    tpu.vector_store %arg7[%c0_6, %c0_7], %8 {strides = array<i32>} : memref<16x128xf32, #tpu.memory_space<vmem>>, vector<16x128xf32>,
    %c0_i32_8 = arith.constant 0 : i32
    %10 = arith.cmpi eq, %arg2, %c0_i32_8 : i32
    %11 = arith.extui %10 : i1 to i32
    %c0_i32_9 = arith.constant 0 : i32
    %12 = arith.cmpi ne, %11, %c0_i32_9 : i32
    scf.if %12 {
      %c0_10 = arith.constant 0 : index
      %c0_11 = arith.constant 0 : index
      %13 = vector.load %arg7[%c0_10, %c0_11] : memref<16x128xf32, #tpu.memory_space<vmem>>, vector<16x128xf32>
      %c0_12 = arith.constant 0 : index
      %c0_13 = arith.constant 0 : index
      %14 = vector.load %arg5[%c0_12, %c0_13] : memref<1x128xf32, #tpu.memory_space<vmem>>, vector<1x128xf32>
      %15 = vector.broadcast %14 : vector<1x128xf32> to vector<16x128xf32>
      %16 = arith.addf %13, %15 : vector<16x128xf32>
      %c0_14 = arith.constant 0 : index
      %c0_15 = arith.constant 0 : index
      %17 = vector.load %arg6[%c0_14, %c0_15] : memref<16x128xf32, #tpu.memory_space<vmem>>, vector<16x128xf32>
      tpu.vector_store %arg6[%c0_14, %c0_15], %16 {strides = array<i32>} : memref<16x128xf32, #tpu.memory_space<vmem>>, vector<16x128xf32>,
    } else {
    }
    return
  }
  func.func @transform_0(%arg0: i32, %arg1: i32, %arg2: i32) -> (i32, i32) {
    %c0_i32 = arith.constant 0 : i32
    return %arg0, %arg2 : i32, i32
  }
  func.func @transform_1(%arg0: i32, %arg1: i32, %arg2: i32) -> (i32, i32) {
    %c0_i32 = arith.constant 0 : i32
    return %arg2, %arg1 : i32, i32
  }
  func.func @transform_2(%arg0: i32, %arg1: i32, %arg2: i32) -> (i32, i32) {
    %c0_i32 = arith.constant 0 : i32
    %c0_i32_0 = arith.constant 0 : i32
    return %c0_i32, %arg1 : i32, i32
  }
  func.func @transform_3(%arg0: i32, %arg1: i32, %arg2: i32) -> (i32, i32) {
    %c0_i32 = arith.constant 0 : i32
    return %arg0, %arg1 : i32, i32
  }
}

module attributes {stable_mosaic.version = 11 : i64} {
  func.func @kernel(%arg0: i32, %arg1: i32, %arg2: i32, %arg3: memref<16x128xf32, #tpu.memory_space<vmem>>, %arg4: memref<128x256xbf16, #tpu.memory_space<vmem>>, %arg5: memref<1x256xf32, #tpu.memory_space<vmem>>, %arg6: memref<16x256xf32, #tpu.memory_space<vmem>>, %arg7: memref<16x256xf32, #tpu.memory_space<vmem>>) attributes {dimension_semantics = [#tpu.dimension_semantics<parallel>, #tpu.dimension_semantics<parallel>, #tpu.dimension_semantics<arbitrary>], iteration_bounds = array<i64: 1, 1, 1>, scalar_prefetch = 0 : i64, scratch_operands = 1 : i64, tpu.core_type = #tpu.core_type<tc>, window_params = [{transform_indices = @transform_0, window_bounds = array<i64: 16, 128>}, {transform_indices = @transform_1, window_bounds = array<i64: 128, 256>}, {transform_indices = @transform_2, window_bounds = array<i64: 1, 256>}, {transform_indices = @transform_3, window_bounds = array<i64: 16, 256>}]} {
    %c0_i32 = arith.constant 0 : i32
    %0 = arith.cmpi eq, %arg2, %c0_i32 : i32
    %1 = arith.extui %0 : i1 to i32
    %c0_i32_0 = arith.constant 0 : i32
    %2 = arith.cmpi ne, %1, %c0_i32_0 : i32
    scf.if %2 {
      %cst_10 = arith.constant 0.000000e+00 : f32
      %13 = vector.broadcast %cst_10 : f32 to vector<16x256xf32>
      %c0_11 = arith.constant 0 : index
      %c0_12 = arith.constant 0 : index
      %14 = vector.load %arg7[%c0_11, %c0_12] : memref<16x256xf32, #tpu.memory_space<vmem>>, vector<16x256xf32>
      tpu.vector_store %arg7[%c0_11, %c0_12], %13 {strides = array<i32>} : memref<16x256xf32, #tpu.memory_space<vmem>>, vector<16x256xf32>,
    } else {
    }
    %c0 = arith.constant 0 : index
    %c0_1 = arith.constant 0 : index
    %3 = vector.load %arg7[%c0, %c0_1] : memref<16x256xf32, #tpu.memory_space<vmem>>, vector<16x256xf32>
    %c0_2 = arith.constant 0 : index
    %c0_3 = arith.constant 0 : index
    %4 = vector.load %arg3[%c0_2, %c0_3] : memref<16x128xf32, #tpu.memory_space<vmem>>, vector<16x128xf32>
    %5 = arith.truncf %4 : vector<16x128xf32> to vector<16x128xbf16>
    %c0_4 = arith.constant 0 : index
    %c0_5 = arith.constant 0 : index
    %6 = vector.load %arg4[%c0_4, %c0_5] : memref<128x256xbf16, #tpu.memory_space<vmem>>, vector<128x256xbf16>
    %cst = arith.constant dense<0.000000e+00> : vector<16x256xf32>
    %7 = tpu.matmul %5, %6, %cst {dimension_numbers = #tpu.dot_dimension_numbers<[1], [0], [0], [1], [0, 0, 1, 1], [], []>} : vector<16x128xbf16>, vector<128x256xbf16>, vector<16x256xf32> -> vector<16x256xf32>
    %8 = arith.addf %3, %7 : vector<16x256xf32>
    %c0_6 = arith.constant 0 : index
    %c0_7 = arith.constant 0 : index
    %9 = vector.load %arg7[%c0_6, %c0_7] : memref<16x256xf32, #tpu.memory_space<vmem>>, vector<16x256xf32>
    tpu.vector_store %arg7[%c0_6, %c0_7], %8 {strides = array<i32>} : memref<16x256xf32, #tpu.memory_space<vmem>>, vector<16x256xf32>,
    %c0_i32_8 = arith.constant 0 : i32
    %10 = arith.cmpi eq, %arg2, %c0_i32_8 : i32
    %11 = arith.extui %10 : i1 to i32
    %c0_i32_9 = arith.constant 0 : i32
    %12 = arith.cmpi ne, %11, %c0_i32_9 : i32
    scf.if %12 {
      %c0_10 = arith.constant 0 : index
      %c0_11 = arith.constant 0 : index
      %13 = vector.load %arg7[%c0_10, %c0_11] : memref<16x256xf32, #tpu.memory_space<vmem>>, vector<16x256xf32>
      %c0_12 = arith.constant 0 : index
      %c0_13 = arith.constant 0 : index
      %14 = vector.load %arg5[%c0_12, %c0_13] : memref<1x256xf32, #tpu.memory_space<vmem>>, vector<1x256xf32>
      %15 = vector.broadcast %14 : vector<1x256xf32> to vector<16x256xf32>
      %16 = arith.addf %13, %15 : vector<16x256xf32>
      %c0_14 = arith.constant 0 : index
      %c0_15 = arith.constant 0 : index
      %17 = vector.load %arg6[%c0_14, %c0_15] : memref<16x256xf32, #tpu.memory_space<vmem>>, vector<16x256xf32>
      tpu.vector_store %arg6[%c0_14, %c0_15], %16 {strides = array<i32>} : memref<16x256xf32, #tpu.memory_space<vmem>>, vector<16x256xf32>,
    } else {
    }
    return
  }
  func.func @transform_0(%arg0: i32, %arg1: i32, %arg2: i32) -> (i32, i32) {
    %c0_i32 = arith.constant 0 : i32
    return %arg0, %arg2 : i32, i32
  }
  func.func @transform_1(%arg0: i32, %arg1: i32, %arg2: i32) -> (i32, i32) {
    %c0_i32 = arith.constant 0 : i32
    return %arg2, %arg1 : i32, i32
  }
  func.func @transform_2(%arg0: i32, %arg1: i32, %arg2: i32) -> (i32, i32) {
    %c0_i32 = arith.constant 0 : i32
    %c0_i32_0 = arith.constant 0 : i32
    return %c0_i32, %arg1 : i32, i32
  }
  func.func @transform_3(%arg0: i32, %arg1: i32, %arg2: i32) -> (i32, i32) {
    %c0_i32 = arith.constant 0 : i32
    return %arg0, %arg1 : i32, i32
  }
}

</mosaic_0001>

<bundles_post_ra>
// kernel: encode_and_precompute.12
= control target key start
LH: loop header
LB: loop body
LE: loop exit
PB: predicated region body
PF: predicated region fallthrough
CT: control target
= control target key end

     0   :  { %s125_s0 = inlined_call_operand.vmem [shape: f32[16,128], index: 0, kind: input, shape index: {}]   ;;  %s126_s1 = inlined_call_operand.vmem [shape: f32[16,128], index: 1, kind: input, shape index: {}]   ;;  %s127_s2 = inlined_call_operand.vmem [shape: f32[1,128], index: 2, kind: input, shape index: {}]   ;;  %s128_s3 = inlined_call_operand.vmem [shape: f32[1,128], index: 3, kind: input, shape index: {}]   ;;  %s129_s4 = inlined_call_operand.vmem [shape: f32[16,128], index: 4, kind: output, shape index: {}]  }
   0x1   :  { %v17_v0 = vld [vmem:[%s125_s0] sm:$0xff]  ;;  %v18_v2 = vld [vmem:[%s125_s0 + $0x8] sm:$0xff] }
   0x2   :  { %v19_v1 = vld [vmem:[%s126_s1] sm:$0xff]  ;;  %v20_v4 = vld [vmem:[%s126_s1 + $0x8] sm:$0xff] }
   0x3   :  { %v21_v3 = vadd.f32 %v19_v1, %v17_v0  ;;  %v22_v5 = vadd.f32 %v20_v4, %v18_v2  ;;  %v70_v21 = vld [vmem:[%s127_s2] ss:$0 sm:$0xff] }
   0x4   :  { %v71_v23 = vld [vmem:[%s128_s3] ss:$0 sm:$0xff] }
   0x5   :  { %23 = vadd.xlane.f32.xlu0 %v21_v3 }
   0x9   :  { %25 = vadd.xlane.f32.xlu0 %v22_v5 }
  0x8e   :  { %v24_v6 = vpop.xlane.xlu0 %23 }
  0x8f   :  { %v28_v7 = vmul.f32 0.0078125, %v24_v6 }
  0x91   :  { %v30_v8 = vsub.f32 %v21_v3, %v28_v7 }
  0x92   :  { %v26_v9 = vpop.xlane.xlu0 %25 }
  0x93   :  { %v29_v10 = vmul.f32 0.0078125, %v26_v9  ;;  %v32_v11 = vmul.f32 %v30_v8, %v30_v8 }
  0x95   :  { %v31_v12 = vsub.f32 %v22_v5, %v29_v10  ;;  %34 = vadd.xlane.f32.xlu1 %v32_v11 }
  0x97   :  { %v33_v13 = vmul.f32 %v31_v12, %v31_v12 }
  0x99   :  { %36 = vadd.xlane.f32.xlu1 %v33_v13 }
 0x11e   :  { %v35_v14 = vpop.xlane.xlu1 %34 }
 0x11f   :  { %v38_v15 = vmul.f32 0.0078125, %v35_v14 }
 0x121   :  { %v40_v16 = vadd.f32 1e-05, %v38_v15 }
 0x122   :  { %v37_v17 = vpop.xlane.xlu1 %36 }
 0x123   :  { %72 = vrsqrt.f32 %v40_v16  ;;  %v39_v18 = vmul.f32 0.0078125, %v37_v17 }
 0x125   :  { %v41_v19 = vadd.f32 1e-05, %v39_v18 }
 0x127   :  { %74 = vrsqrt.f32 %v41_v19 }
 0x130   :  { %v73_v20 = vpop.eup %72 }
 0x131   :  { %v44_v22 = vmul.f32 %v73_v20, %v30_v8 }
 0x133   :  { %v53_v24 = vmul.f32 %v70_v21, %v44_v22 }
 0x134   :  { %v75_v25 = vpop.eup %74 }
 0x135   :  { %v62_v26 = vadd.f32 %v71_v23, %v53_v24  ;;  %v45_v27 = vmul.f32 %v75_v25, %v31_v12 }
 0x137   :  { %64 = vst [vmem:[%s129_s4] sm:$0xff] %v62_v26  ;;  %v54_v28 = vmul.f32 %v70_v21, %v45_v27 }
 0x139   :  { %v63_v29 = vadd.f32 %v71_v23, %v54_v28 }
 0x13b   :  { %65 = vst [vmem:[%s129_s4 + $0x8] sm:$0xff] %v63_v29 }

// kernel: encode_and_precompute.11
= control target key start
LH: loop header
LB: loop body
LE: loop exit
PB: predicated region body
PF: predicated region fallthrough
CT: control target
= control target key end

     0   :  { %v203_v0 = vmov 0.0   ;;  %vm204_vm0 = vmmov 0   ;;  %s264_s1 = inlined_call_operand.vmem [shape: bf16[128,128], index: 1, kind: input, shape index: {}]   ;;  %s265_s0 = inlined_call_operand.vmem [shape: f32[16,128], index: 0, kind: input, shape index: {}]   ;;  %s266_s2 = inlined_call_operand.vmem [shape: f32[1,128], index: 2, kind: input, shape index: {}]   ;;  %s267_s3 = inlined_call_operand.vmem [shape: f32[16,128], index: 3, kind: output, shape index: {}]  }
   0x1   :  { %173 = vmatprep.subr.bf16.mxu0 %v203_v0  ;;  %v195_v1 = vld [vmem:[%s264_s1 + $0x38] sm:$0xff]   ;;  %189 = vmatprep.mubr.msk.bf16.mxu0 %vm204_vm0, %v203_v0  ;;  %v196_v2 = vld [vmem:[%s264_s1 + $0x30] sm:$0xff]   ;;  %v197_v3 = vld [vmem:[%s264_s1 + $0x28] sm:$0xff]  }
   0x2   :  { %174 = vmatpush3.bf16.msra.mxu0 %v195_v1  ;;  %v198_v4 = vld [vmem:[%s264_s1 + $0x20] sm:$0xff]   ;;  %v199_v5 = vld [vmem:[%s264_s1 + $0x18] sm:$0xff]   ;;  %v200_v6 = vld [vmem:[%s264_s1 + $0x10] sm:$0xff]  }
   0x3   :  { %175 = vmatprep.subr.bf16.mxu0 %v203_v0  ;;  %v201_v7 = vld [vmem:[%s264_s1 + $0x8] sm:$0xff]   ;;  %v202_v8 = vld [vmem:[%s264_s1] sm:$0xff]  }
   0x4   :  { %v23_v9 = vld [vmem:[%s265_s0] sm:$0xff]  ;;  %v24_v10 = vld [vmem:[%s265_s0 + $0x8] sm:$0xff] }
   0x5   :  { %v25_v11 = vpack.c.bf16 %v24_v10, %v23_v9  ;;  %v163_v12 = vld [vmem:[%s266_s2] ss:$0 sm:$0xff] }
   0x6   :  { %176 = vmatpush3.bf16.msra.mxu0 %v196_v2 }
   0x7   :  { %177 = vmatprep.subr.bf16.mxu0 %v203_v0 }
   0xa   :  { %178 = vmatpush3.bf16.msra.mxu0 %v197_v3 }
   0xb   :  { %179 = vmatprep.subr.bf16.mxu0 %v203_v0 }
   0xe   :  { %180 = vmatpush3.bf16.msra.mxu0 %v198_v4 }
   0xf   :  { %181 = vmatprep.subr.bf16.mxu0 %v203_v0 }
  0x12   :  { %182 = vmatpush3.bf16.msra.mxu0 %v199_v5 }
  0x13   :  { %183 = vmatprep.subr.bf16.mxu0 %v203_v0 }
  0x16   :  { %184 = vmatpush3.bf16.msra.mxu0 %v200_v6 }
  0x17   :  { %185 = vmatprep.subr.bf16.mxu0 %v203_v0 }
  0x1a   :  { %186 = vmatpush3.bf16.msra.mxu0 %v201_v7 }
  0x1b   :  { %187 = vmatprep.subr.bf16.mxu0 %v203_v0 }
  0x1e   :  { %188 = vmatpush3.bf16.msra.mxu0 %v202_v8 }
  0x21   :  { %190 = vmatmul.mubr.bf16.vlgmr.msra.gmra.mxu0 %v25_v11 }
  0xe1   :  { %v124_v13 = vpop.f32.mrf.mxu0 }
  0xe2   :  { %v147_v14 = vadd.f32 %v163_v12, %v124_v13 }
  0xe3   :  { %v191_v15 = vpop.f32.mrf.mxu0 }
  0xe4   :  { %149 = vst [vmem:[%s267_s3] sm:$0xff] %v147_v14 }
  0xe5   :  { %v127_v16 = vpop.f32.mrf.mxu0 }
  0xe6   :  { %v148_v17 = vadd.f32 %v163_v12, %v127_v16 }
  0xe7   :  { %v192_v18 = vpop.f32.mrf.mxu0 }
  0xe8   :  { %150 = vst [vmem:[%s267_s3 + $0x8] sm:$0xff] %v148_v17 }

// kernel: encode_and_precompute.9
= control target key start
LH: loop header
LB: loop body
LE: loop exit
PB: predicated region body
PF: predicated region fallthrough
CT: control target
= control target key end

     0   :  { %s792_s12 = smov 0   ;;  %s794_s13 = smov 0   ;;  %s897_s0 = inlined_call_operand.vmem [shape: f32[16,128], index: 0, kind: input, shape index: {}]   ;;  %s898_s1 = inlined_call_operand.vmem [shape: bf16[128,384], index: 1, kind: input, shape index: {}]   ;;  %s899_s2 = inlined_call_operand.vmem [shape: f32[1,384], index: 2, kind: input, shape index: {}]   ;;  %s900_s3 = inlined_call_operand.vmem [shape: f32[16,384], index: 3, kind: output, shape index: {}]  }
   0x1   :  { %s796_s14 = smov 0   ;;  %s798_s15 = smov 0  }
   0x2   :  { %s800_s16 = smov 0  }
   0x3 LB: > { %s28_s17 = sadd.s32 1, %s764_s15  ;;  %s628_s18 = sadd.s32 4294967295, %s768_s16   ;;  %s768_s16 = sphi %s800_s16, %s13_s16   ;;  %s764_s15 = sphi %s798_s15, %s905_s15   ;;  %s760_s14 = sphi %s796_s14, %s904_s14   ;;  %s756_s13 = sphi %s794_s13, %s903_s13   ;;  %s752_s12 = sphi %s792_s12, %s902_s12  }
   0x4   : > { %p30_p0 = scmp.ge.s32.totalorder %s28_s17, 3  ;;  %p76_p1 = scmp.ne.s32.totalorder %s756_s13, %s752_s12 }
   0x5   : > { %p77_p2 = scmp.eq.s32.totalorder %s768_s16, 0  ;;  %p134_p4 = scmp.eq.s32.totalorder %s628_s18, 2 }
   0x6   : > { %s907_s17 = smov (%p30_p0, %s28_s17), 0  ;;  %s69_s20 = sadd.s32 1, %s756_s13 }
   0x7   : > { %p78_p3 = por %p77_p2, %p76_p1  ;;  %s65_s19 = ssub.s32 %s764_s15, %s907_s17 }
   0x8   : > { %p67_p5 = scmp.eq.s32.totalorder %s65_s19, 0  ;;  %p827_p6 = por %p134_p4, %p76_p1 }
   0x9   : > { %p632_p7 = scmp.ge.s32.totalorder %s768_s16, 3 }
   0xa   : > { %s832_s22 = scalar_select %p67_p5, %s756_s13, %s69_s20  }
   0xb   : > { %168 = sbr.rel (%p632_p7) target bundleno = 30 (0x1e), region = 20 }
  0x10   : > { %171 = sbr.rel (!%p78_p3) target bundleno = 30 (0x1e), region = 24  ;;  %s173_s23 = sand.u32 (%p78_p3), 1, %s756_s13  }
  0x11   : > { %s634_s24 = sshll.u32 (%p78_p3), %s764_s15, 2  ;;  %s633_s25 = sshll.u32 (%p78_p3), %s173_s23, 6 }
  0x12   : > { %s840_s28 = scalar_lea.vmem (%p78_p3), %s898_s1, %s634_s24  ;;  %s175_s29 = scalar_lea.vmem (%p78_p3), [#allocation3], %s633_s25 }
  0x13   : > { %v197_v0 = vld [vmem:[%s840_s28] sm:$0xf] (%p78_p3)  ;;  %v199_v1 = vld [vmem:[%s840_s28 + $0xc] sm:$0xf] (%p78_p3)  ;;  %v201_v2 = vld [vmem:[%s840_s28 + $0x18] sm:$0xf] (%p78_p3) }
  0x14   : > { %198 = vst [vmem:[%s175_s29] sm:$0xf] (%p78_p3), %v197_v0  ;;  %200 = vst [vmem:[%s175_s29 + $0x4] sm:$0xf] (%p78_p3), %v199_v1  ;;  %v203_v3 = vld [vmem:[%s840_s28 + $0x24] sm:$0xf] (%p78_p3) }
  0x15   : > { %v205_v4 = vld [vmem:[%s840_s28 + $0x30] sm:$0xf]  ;;  %202 = vst [vmem:[%s175_s29 + $0x8] sm:$0xf] %v201_v2  ;;  %204 = vst [vmem:[%s175_s29 + $0xc] sm:$0xf] %v203_v3 }
  0x16   : > { %206 = vst [vmem:[%s175_s29 + $0x10] sm:$0xf] %v205_v4  ;;  %v207_v5 = vld [vmem:[%s840_s28 + $0x3c] sm:$0xf]  ;;  %v209_v6 = vld [vmem:[%s840_s28 + $0x48] sm:$0xf] }
  0x17   : > { %v211_v7 = vld [vmem:[%s840_s28 + $0x54] sm:$0xf]  ;;  %208 = vst [vmem:[%s175_s29 + $0x14] sm:$0xf] %v207_v5  ;;  %210 = vst [vmem:[%s175_s29 + $0x18] sm:$0xf] %v209_v6 }
  0x18   : > { %212 = vst [vmem:[%s175_s29 + $0x1c] sm:$0xf] %v211_v7  ;;  %v213_v8 = vld [vmem:[%s840_s28 + $0x60] sm:$0xf]  ;;  %v215_v9 = vld [vmem:[%s840_s28 + $0x6c] sm:$0xf] }
  0x19   : > { %v217_v10 = vld [vmem:[%s840_s28 + $0x78] sm:$0xf]  ;;  %214 = vst [vmem:[%s175_s29 + $0x20] sm:$0xf] %v213_v8  ;;  %216 = vst [vmem:[%s175_s29 + $0x24] sm:$0xf] %v215_v9 }
  0x1a   : > { %218 = vst [vmem:[%s175_s29 + $0x28] sm:$0xf] %v217_v10  ;;  %v219_v11 = vld [vmem:[%s840_s28 + $0x84] sm:$0xf]  ;;  %v221_v12 = vld [vmem:[%s840_s28 + $0x90] sm:$0xf] }
  0x1b   : > { %v223_v13 = vld [vmem:[%s840_s28 + $0x9c] sm:$0xf]  ;;  %220 = vst [vmem:[%s175_s29 + $0x2c] sm:$0xf] %v219_v11  ;;  %222 = vst [vmem:[%s175_s29 + $0x30] sm:$0xf] %v221_v12 }
  0x1c   : > { %224 = vst [vmem:[%s175_s29 + $0x34] sm:$0xf] %v223_v13  ;;  %v225_v14 = vld [vmem:[%s840_s28 + $0xa8] sm:$0xf]  ;;  %v227_v15 = vld [vmem:[%s840_s28 + $0xb4] sm:$0xf] }
  0x1d   : > { %226 = vst [vmem:[%s175_s29 + $0x38] sm:$0xf] %v225_v14  ;;  %228 = vst [vmem:[%s175_s29 + $0x3c] sm:$0xf] %v227_v15 }
  0x1e PF: > { %p635_p8 = scmp.ge.s32.totalorder %s768_s16, 1  ;;  %p289_p9 = scmp.lt.s32.totalorder %s768_s16, 4 }
  0x20   : > { %p290_p10 = pnand %p635_p8, %p289_p9 }
  0x21   : > { %s296_s30 = sand.u32 (!%p290_p10), 1, %s752_s12   ;;  %p339_p11 = scmp.lt.s32.totalorder (!%p290_p10), %s760_s14, 2 }
  0x22   : > { %293 = sbr.rel (%p290_p10) target bundleno = 280 (0x118), region = 69  ;;  %s636_s4 = sshll.u32 (!%p290_p10), %s296_s30, 6 }
  0x23   : > { %s298_s5 = scalar_lea.vmem (!%p290_p10), [#allocation3], %s636_s4  ;;  %s637_s20 = sshll.u32 (!%p290_p10), %s296_s30, 4 }
  0x24   : > { %s328_s23 = scalar_lea.vmem (!%p290_p10), [#allocation4], %s637_s20 }
  0x27   : > { %v770_v16 = vmov 0.0   ;;  %vm771_vm0 = vmmov 0   ;;  %v722_v17 = vld [vmem:[%s298_s5 + $0x38] sm:$0xff]   ;;  %v723_v18 = vld [vmem:[%s298_s5 + $0x30] sm:$0xff]   ;;  %v724_v19 = vld [vmem:[%s298_s5 + $0x28] sm:$0xff]   ;;  %s340_s10 = scalar_select %p339_p11, %s760_s14, 2 }
  0x28   : > { %660 = vmatprep.subr.bf16.mxu0 %v770_v16  ;;  %676 = vmatprep.mubr.msk.bf16.mxu0 %vm771_vm0, %v770_v16  ;;  %v725_v20 = vld [vmem:[%s298_s5 + $0x20] sm:$0xff]   ;;  %v726_v21 = vld [vmem:[%s298_s5 + $0x18] sm:$0xff]   ;;  %v727_v22 = vld [vmem:[%s298_s5 + $0x10] sm:$0xff]   ;;  %s648_s24 = sshll.u32 (%p827_p6), %s760_s14, 3 }
  0x29   : > { %661 = vmatpush3.bf16.msra.mxu0 %v722_v17  ;;  %v728_v23 = vld [vmem:[%s298_s5 + $0x8] sm:$0xff]   ;;  %v729_v24 = vld [vmem:[%s298_s5] sm:$0xff]   ;;  %s341_s19 = scalar_lea.vmem %s899_s2, %s340_s10  ;;  %s491_s26 = scalar_lea.vmem (%p827_p6), %s900_s3, %s648_s24 }
  0x2a   : > { %662 = vmatprep.subr.bf16.mxu0 %v770_v16  ;;  %v352_v25 = vld [vmem:[%s897_s0] sm:$0xff]  ;;  %v353_v26 = vld [vmem:[%s897_s0 + $0x8] sm:$0xff] }
  0x2b   : > { %v354_v27 = vpack.c.bf16 %v353_v26, %v352_v25  ;;  %v646_v28 = vld [vmem:[%s341_s19] ss:$0 sm:$0xff] }
  0x2d   : > { %663 = vmatpush3.bf16.msra.mxu0 %v723_v18 }
  0x2e   : > { %664 = vmatprep.subr.bf16.mxu0 %v770_v16 }
  0x31   : > { %665 = vmatpush3.bf16.msra.mxu0 %v724_v19 }
  0x32   : > { %666 = vmatprep.subr.bf16.mxu0 %v770_v16 }
  0x35   : > { %667 = vmatpush3.bf16.msra.mxu0 %v725_v20 }
  0x36   : > { %668 = vmatprep.subr.bf16.mxu0 %v770_v16 }
  0x39   : > { %669 = vmatpush3.bf16.msra.mxu0 %v726_v21 }
  0x3a   : > { %670 = vmatprep.subr.bf16.mxu0 %v770_v16 }
  0x3d   : > { %671 = vmatpush3.bf16.msra.mxu0 %v727_v22 }
  0x3e   : > { %672 = vmatprep.subr.bf16.mxu0 %v770_v16 }
  0x41   : > { %673 = vmatpush3.bf16.msra.mxu0 %v728_v23 }
  0x42   : > { %674 = vmatprep.subr.bf16.mxu0 %v770_v16 }
  0x45   : > { %675 = vmatpush3.bf16.msra.mxu0 %v729_v24 }
  0x48   : > { %677 = vmatmul.mubr.bf16.vlgmr.msra.gmra.mxu0 %v354_v27 }
 0x108   : > { %v453_v29 = vpop.f32.mrf.mxu0 }
 0x109   : > { %v476_v30 = vadd.f32 %v646_v28, %v453_v29 }
 0x10a   : > { %v678_v31 = vpop.f32.mrf.mxu0 }
 0x10b   : > { %478 = vst [vmem:[%s328_s23] sm:$0xff] %v476_v30  ;;  %486 = sbr.rel (!%p827_p6) target bundleno = 280 (0x118), region = 85 }
 0x10c   : > { %v456_v32 = vpop.f32.mrf.mxu0 }
 0x10d   : > { %v477_v33 = vadd.f32 %v646_v28, %v456_v32 }
 0x10e   : > { %v679_v34 = vpop.f32.mrf.mxu0 }
 0x10f   : > { %479 = vst [vmem:[%s328_s23 + $0x8] sm:$0xff] %v477_v33 }
 0x112   : > { %v522_v35 = vld [vmem:[%s328_s23] sm:$0xff] }
 0x113   : > { %523 = vst [vmem:[%s491_s26] sm:$0xff] %v522_v35 }
 0x116   : > { %v524_v36 = vld [vmem:[%s328_s23 + $0x8] sm:$0xff] }
 0x117   : > { %525 = vst [vmem:[%s491_s26 + $0x18] sm:$0xff] %v524_v36 }
 0x118 PF: > { %s13_s16 = sadd.s32 1, %s768_s16   ;;  %s902_s12 = smov %s756_s13 }
 0x119   : > { %p10_p12 = scmp.ge.s32.totalorder %s13_s16, 5   ;;  %s903_s13 = smov %s832_s22 }
 0x11a   : > { %s904_s14 = smov %s764_s15  ;;  %s905_s15 = smov %s907_s17 }
 0x11b   :  { %12 = sbr.rel (!%p10_p12) target bundleno = 3 (0x3), region = 160 }

// kernel: encode_and_precompute.10
= control target key start
LH: loop header
LB: loop body
LE: loop exit
PB: predicated region body
PF: predicated region fallthrough
CT: control target
= control target key end

     0   :  { %s1269_s15 = smov 0   ;;  %s1386_s0 = inlined_call_operand.vmem [shape: f32[2,8,384], index: 0, kind: input, shape index: {}, may-alias: {0,1,2}]   ;;  %s1387_s1 = inlined_call_operand.vmem [shape: f32[2,8,384], index: 1, kind: input, shape index: {}, may-alias: {0,1,2}]   ;;  %s1388_s2 = inlined_call_operand.vmem [shape: f32[2,8,384], index: 2, kind: input, shape index: {}, may-alias: {0,1,2}]   ;;  %s1389_s3 = inlined_call_operand.vmem [shape: f32[2,1,8], index: 3, kind: input, shape index: {}]   ;;  %s1390_s4 = inlined_call_operand.vmem [shape: f32[2,8,128], index: 4, kind: output, shape index: {}]  }
   0x1 LB: > { %s1089_s16 = sadd.s32 4294967295, %s1237_s15   ;;  %p1111_p0 = scmp.ge.s32.totalorder %s1237_s15, 1  ;;  %s1237_s15 = sphi %s1269_s15, %s14_s15  }
   0x2   : > { %p336_p1 = scmp.lt.s32.totalorder %s1237_s15, 3 }
   0x4   : > { %p337_p2 = pnand %p1111_p0, %p336_p1 }
   0x5   : > { %p417_p3 = scmp.lt.s32.totalorder (!%p337_p2), %s1089_s16, 0  ;;  %s418_s17 = ssub.s32 (!%p337_p2), 0, %s1089_s16 }
   0x6   : > { %340 = sbr.rel (%p337_p2) target bundleno = 1424 (0x590), region = 36  ;;  %s1113_s18 = smin.u32 (!%p337_p2), %s1089_s16, %s418_s17 }
   0x7   : > { %s420_s19 = sand.u32 (!%p337_p2), 1, %s1113_s18   ;;  %p412_p4 = scmp.lt.s32.totalorder (!%p337_p2), %s1089_s16, 1 }
   0x8   : > { %s421_s20 = ssub.s32 (!%p337_p2), 0, %s420_s19  ;;  %s1241_s7 = smov (!%p337_p2), 96  }
   0x9   : > { %s1242_s8 = smov (!%p337_p2), 64   ;;  %s1243_s9 = smov (!%p337_p2), 32  }
   0xb   : > { %v1239_v0 = vmov 0.0   ;;  %vm1240_vm0 = vmmov 0   ;;  %s1392_s20 = smov (!%p417_p3, %s421_s20), %s420_s19  ;;  %s1396_s16 = smov (!%p412_p4, %s1089_s16), 1  ;;  %vm518_vm1 = vcmask 261120   ;;  %v567_v6 = vlaneseq }
   0xc   : > { %1153 = vmatprep.subr.bf16.mxu0 %v1239_v0  ;;  %1155 = vmatprep.mubr.msk.bf16.mxu0 %vm1240_vm0, %v1239_v0  ;;  %p1115_p5 = scmp.lt.s32.totalorder %s1392_s20, 0  ;;  %s427_s21 = sadd.s32 2, %s1392_s20  ;;  %vm573_vm2 = vcmask 64512   ;;  %vm589_vm3 = vcmask 1043456   ;;  %vm753_vm4 = vcmask 523520   ;;  %vm871_vm5 = vcmask 785920  }
   0xd   : > { %1159 = vmatprep.subr.bf16.mxu1 %v1239_v0  ;;  %1161 = vmatprep.mubr.msk.bf16.mxu1 %vm1240_vm0, %v1239_v0  ;;  %s1201_s22 = smul.u32 24, %s1396_s16  ;;  %v568_v9 = vshrl.u32 %v567_v6, 7  ;;  %s1124_s13 = sshll.u32 %s1396_s16, 3  ;;  %vm989_vm6 = vcmask 1048320  }
   0xe   : > { %s1394_s21 = smov (!%p1115_p5, %s427_s21), %s1392_s20  ;;  %s1346_s18 = scalar_lea.vmem %s1390_s4, %s1124_s13 }
   0xf   : > { %p429_p6 = scmp.lt.s32.totalorder %s1394_s21, 1  ;;  %s416_s29 = scalar_lea.vmem %s1386_s0, %s1201_s22  ;;  %v569_v11 = vsub.s32 0, %v568_v9 }
  0x10   : > { %v509_v4 = vld [vmem:[%s416_s29] sm:$0xff] }
  0x11   : > { %s1398_s21 = smov (!%p429_p6, %s1394_s21), 1  ;;  %v510_v5 = vpack.c.bf16 %v509_v4, %v509_v4 }
  0x12   : > { %s1116_s23 = smul.u32 24, %s1398_s21  ;;  %s491_s6 = scalar_lea.vmem %s1389_s3, %s1398_s21 }
  0x13   : > { %v515_v7 = vld [vmem:[%s491_s6] sm:$0x1] }
  0x14   : > { %s1038_s26 = scalar_lea.vmem %s1387_s1, %s1116_s23  ;;  %v516_v8 = vsub.f32 1.0, %v515_v7  ;;  %s1042_s12 = scalar_lea.vmem %s1388_s2, %s1116_s23 }
  0x15   : > { %v1125_v1 = vld [vmem:[%s1038_s26 + $0x8] sm:$0xff]  ;;  %v1126_v25 = vld [vmem:[%s1042_s12 + $0x10] sm:$0xff] }
  0x16   : > { %v512_v2 = vpack.c.bf16 %v1125_v1, %v1125_v1  ;;  %v517_v10 = vmul.f32 -1e+09, %v516_v8  ;;  %v1321_v26 = vpack.c.bf16 %v1126_v25, %v1126_v25 }
  0x18   : > { %v523_v3 = vsel %vm518_vm1, %v512_v2, 0  ;;  %v1306_v12 = vrot.slane %v517_v10, %v569_v11  ;;  %638 = vrot.lane.b32.xlu1 %v512_v2, %s1241_s7  ;;  %v591_v27 = vsel %vm589_vm3, %v1321_v26, 0 }
  0x19   : > { %1154 = vmatpush3.bf16.xpose.msra.mxu0 %v523_v3  ;;  %1160 = vmatpush3.bf16.msra.mxu1 %v591_v27 }
  0x1a   : > { %1171 = vmatprep.subr.bf16.mxu0 %v1239_v0  ;;  %1165 = vmatprep.subr.bf16.mxu1 %v1239_v0 }
  0x1c   : > { %635 = vrot.lane.b32.xlu1 %v510_v5, %s1241_s7 }
  0x20   : > { %1156 = vmatmul.mubr.msk.bf16.vlgmr.msra.gmra.mxu0 %vm518_vm1, %v510_v5  ;;  %755 = vrot.lane.b32.xlu1 %v510_v5, %s1242_s8 }
  0x21   : > { %1173 = vmatprep.mubr.msk.bf16.mxu0 %vm1240_vm0, %v1239_v0 }
  0x24   : > { %875 = vrot.lane.b32.xlu1 %v512_v2, %s1243_s9 }
  0x28   : > { %873 = vrot.lane.b32.xlu1 %v510_v5, %s1243_s9 }
  0x8a   : > { %v639_v30 = vpop.permute.xlu1 %638 }
  0x8b   : > { %v644_v32 = vsel %vm518_vm1, %v639_v30, 0 }
  0x8e   : > { %v636_v34 = vpop.permute.xlu1 %635 }
  0x92   : > { %v756_v36 = vpop.permute.xlu1 %755 }
  0x96   : > { %v876_v38 = vpop.permute.xlu1 %875 }
  0x97   : > { %v881_v39 = vsel %vm518_vm1, %v876_v38, 0 }
  0x9a   : > { %v874_v40 = vpop.permute.xlu1 %873 }
  0xe0   : > { %v559_v13 = vpop.f32.mrf.mxu0 }
  0xe1   : > { %v565_v14 = vmul.f32 0.17677669, %v559_v13 }
  0xe2   : > { %v1157_v15 = vpop.f32.mrf.mxu0 }
  0xe3   : > { %v572_v16 = vadd.f32 %v1306_v12, %v565_v14 }
  0xe4   : > { %v562_v17 = vpop.f32.mrf.mxu0 }
  0xe5   : > { %v574_v18 = vsel %vm573_vm2, %v572_v16, -inf }
  0xe6   : > { %575 = vmax.xlane.f32.xlu0 %v574_v18  ;;  %v1158_v19 = vpop.f32.mrf.mxu0 }
 0x16f   : > { %v576_v20 = vpop.xlane.xlu0 %575 }
 0x170   : > { %v577_v21 = vsub.f32 %v572_v16, %v576_v20 }
 0x172   : > { %v578_v22 = vmul.f32 1.442695, %v577_v21 }
 0x174   : > { %1215 = vpow2.f32 %v578_v22 }
 0x181   : > { %v1216_v23 = vpop.eup %1215 }
 0x182   : > { %v580_v24 = vsel %vm573_vm2, %v1216_v23, 0.0 }
 0x183   : > { %581 = vadd.xlane.f32.xlu0 %v580_v24 }
 0x199   : > { %757 = vrot.lane.b32.xlu0 %v512_v2, %s1242_s8 }
 0x20c   : > { %v582_v28 = vpop.xlane.xlu0 %581 }
 0x20d   : > { %1217 = vrcp.f32 %v582_v28 }
 0x210   : > { %v758_v35 = vpop.permute.xlu0 %757 }
 0x211   : > { %v763_v37 = vsel %vm518_vm1, %v758_v35, 0 }
 0x21a   : > { %v1218_v29 = vpop.eup %1217 }
 0x21b   : > { %v584_v31 = vmul.f32 %v1218_v29, %v1216_v23 }
 0x21d   : > { %v585_v33 = vpack.c.bf16 %v584_v31, %v584_v31 }
 0x21f   : > { %1162 = vmatmul.mubr.msk.bf16.vlgmr.msra.gmra.mxu1 %vm573_vm2, %v585_v33 }
 0x220   : > { %1166 = vmatpush3.bf16.xpose.msra.mxu1 %v644_v32  ;;  %1167 = vmatprep.mubr.msk.bf16.mxu1 %vm1240_vm0, %v1239_v0 }
 0x221   : > { %1177 = vmatprep.subr.bf16.mxu1 %v1239_v0 }
 0x227   : > { %1168 = vmatmul.mubr.msk.bf16.vlgmr.msra.gmra.mxu1 %vm518_vm1, %v636_v34 }
 0x228   : > { %1178 = vmatpush3.bf16.xpose.msra.mxu1 %v763_v37  ;;  %1179 = vmatprep.mubr.msk.bf16.mxu1 %vm1240_vm0, %v1239_v0 }
 0x229   : > { %1189 = vmatprep.subr.bf16.mxu1 %v1239_v0 }
 0x22f   : > { %1180 = vmatmul.mubr.msk.bf16.vlgmr.msra.gmra.mxu1 %vm518_vm1, %v756_v36 }
 0x230   : > { %1190 = vmatpush3.bf16.xpose.msra.mxu1 %v881_v39  ;;  %1191 = vmatprep.mubr.msk.bf16.mxu1 %vm1240_vm0, %v1239_v0 }
 0x237   : > { %1192 = vmatmul.mubr.msk.bf16.vlgmr.msra.gmra.mxu1 %vm518_vm1, %v874_v40 }
 0x2df   : > { %v627_v41 = vpop.f32.mrf.mxu1 }
 0x2e0   : > { %633 = vst.msk [vmem:[%s1346_s18] sm:$0xff] %vm518_vm1, %v627_v41 }
 0x2e1   : > { %v1163_v42 = vpop.f32.mrf.mxu1 }
 0x2e3   : > { %v630_v43 = vpop.f32.mrf.mxu1 }
 0x2e5   : > { %v1164_v44 = vpop.f32.mrf.mxu1 }
 0x2e7   : > { %v680_v45 = vpop.f32.mrf.mxu1 }
 0x2e8   : > { %v686_v46 = vmul.f32 0.17677669, %v680_v45 }
 0x2e9   : > { %v1169_v47 = vpop.f32.mrf.mxu1 }
 0x2ea   : > { %v687_v48 = vadd.f32 %v686_v46, %v1306_v12 }
 0x2eb   : > { %v683_v49 = vpop.f32.mrf.mxu1 }
 0x2ec   : > { %v688_v50 = vsel %vm573_vm2, %v687_v48, -inf }
 0x2ed   : > { %689 = vmax.xlane.f32.xlu1 %v688_v50  ;;  %v1170_v51 = vpop.f32.mrf.mxu1 }
 0x2ef   : > { %v799_v52 = vpop.f32.mrf.mxu1 }
 0x2f0   : > { %v805_v53 = vmul.f32 0.17677669, %v799_v52 }
 0x2f1   : > { %v1181_v54 = vpop.f32.mrf.mxu1 }
 0x2f2   : > { %v806_v55 = vadd.f32 %v805_v53, %v1306_v12 }
 0x2f3   : > { %v802_v56 = vpop.f32.mrf.mxu1 }
 0x2f4   : > { %v807_v57 = vsel %vm573_vm2, %v806_v55, -inf }
 0x2f5   : > { %808 = vmax.xlane.f32.xlu0 %v807_v57  ;;  %v1182_v58 = vpop.f32.mrf.mxu1 }
 0x2f7   : > { %v917_v59 = vpop.f32.mrf.mxu1 }
 0x2f8   : > { %v923_v60 = vmul.f32 0.17677669, %v917_v59 }
 0x2f9   : > { %v1193_v61 = vpop.f32.mrf.mxu1 }
 0x2fa   : > { %v924_v62 = vadd.f32 %v923_v60, %v1306_v12 }
 0x2fb   : > { %v920_v63 = vpop.f32.mrf.mxu1 }
 0x2fc   : > { %v925_v1 = vsel %vm573_vm2, %v924_v62, -inf }
 0x2fd   : > { %926 = vmax.xlane.f32.xlu1 %v925_v1  ;;  %v1194_v2 = vpop.f32.mrf.mxu1 }
 0x376   : > { %v690_v3 = vpop.xlane.xlu1 %689 }
 0x377   : > { %v691_v4 = vsub.f32 %v687_v48, %v690_v3 }
 0x379   : > { %v692_v5 = vmul.f32 1.442695, %v691_v4 }
 0x37b   : > { %1219 = vpow2.f32 %v692_v5 }
 0x37e   : > { %v809_v6 = vpop.xlane.xlu0 %808 }
 0x37f   : > { %v810_v7 = vsub.f32 %v806_v55, %v809_v6 }
 0x381   : > { %v811_v8 = vmul.f32 1.442695, %v810_v7 }
 0x383   : > { %1221 = vpow2.f32 %v811_v8 }
 0x386   : > { %v927_v13 = vpop.xlane.xlu1 %926 }
 0x387   : > { %v928_v14 = vsub.f32 %v924_v62, %v927_v13 }
 0x388   : > { %v1220_v9 = vpop.eup %1219 }
 0x389   : > { %v694_v10 = vsel %vm573_vm2, %v1220_v9, 0.0  ;;  %v929_v15 = vmul.f32 1.442695, %v928_v14 }
 0x38a   : > { %695 = vadd.xlane.f32.xlu1 %v694_v10 }
 0x38b   : > { %1223 = vpow2.f32 %v929_v15 }
 0x390   : > { %v1222_v11 = vpop.eup %1221 }
 0x391   : > { %v813_v12 = vsel %vm573_vm2, %v1222_v11, 0.0 }
 0x392   : > { %814 = vadd.xlane.f32.xlu0 %v813_v12 }
 0x398   : > { %v1224_v16 = vpop.eup %1223 }
 0x399   : > { %v931_v17 = vsel %vm573_vm2, %v1224_v16, 0.0 }
 0x39b   : > { %819 = vrot.lane.b32.xlu1 %v1321_v26, %s1242_s8 }
 0x3a8   : > { %701 = vrot.lane.b32.xlu0 %v1321_v26, %s1241_s7 }
 0x3bf   : > { %932 = vadd.xlane.f32.xlu1 %v931_v17 }
 0x3d0   : > { %937 = vrot.lane.b32.xlu1 %v1321_v26, %s1243_s9 }
 0x413   : > { %v696_v18 = vpop.xlane.xlu1 %695 }
 0x414   : > { %1225 = vrcp.f32 %v696_v18 }
 0x417   : > { %v820_v24 = vpop.permute.xlu1 %819 }
 0x418   : > { %v825_v27 = vsel %vm589_vm3, %v820_v24, 0 }
 0x41b   : > { %v815_v19 = vpop.xlane.xlu0 %814 }
 0x41c   : > { %1227 = vrcp.f32 %v815_v19 }
 0x41f   : > { %v702_v20 = vpop.permute.xlu0 %701 }
 0x420   : > { %v707_v21 = vsel %vm589_vm3, %v702_v20, 0 }
 0x421   : > { %v1226_v22 = vpop.eup %1225  ;;  %1172 = vmatpush3.bf16.msra.mxu0 %v707_v21 }
 0x422   : > { %1183 = vmatprep.subr.bf16.mxu0 %v1239_v0  ;;  %v698_v23 = vmul.f32 %v1226_v22, %v1220_v9 }
 0x424   : > { %v699_v25 = vpack.c.bf16 %v698_v23, %v698_v23 }
 0x426   : > { %1174 = vmatmul.mubr.msk.bf16.vlgmr.msra.gmra.mxu0 %vm573_vm2, %v699_v25 }
 0x427   : > { %1184 = vmatpush3.bf16.msra.mxu0 %v825_v27  ;;  %1185 = vmatprep.mubr.msk.bf16.mxu0 %vm1240_vm0, %v1239_v0 }
 0x428   : > { %1195 = vmatprep.subr.bf16.mxu0 %v1239_v0 }
 0x429   : > { %v1228_v26 = vpop.eup %1227 }
 0x42a   : > { %v817_v28 = vmul.f32 %v1228_v26, %v1222_v11 }
 0x42c   : > { %v818_v29 = vpack.c.bf16 %v817_v28, %v817_v28 }
 0x42e   : > { %1186 = vmatmul.mubr.msk.bf16.vlgmr.msra.gmra.mxu0 %vm573_vm2, %v818_v29 }
 0x42f   : > { %1197 = vmatprep.mubr.msk.bf16.mxu0 %vm1240_vm0, %v1239_v0 }
 0x448   : > { %v933_v30 = vpop.xlane.xlu1 %932 }
 0x449   : > { %1229 = vrcp.f32 %v933_v30 }
 0x44c   : > { %v938_v31 = vpop.permute.xlu1 %937 }
 0x44d   : > { %v943_v32 = vsel %vm589_vm3, %v938_v31, 0 }
 0x44e   : > { %1196 = vmatpush3.bf16.msra.mxu0 %v943_v32 }
 0x456   : > { %v1230_v33 = vpop.eup %1229 }
 0x457   : > { %v935_v34 = vmul.f32 %v1230_v33, %v1224_v16 }
 0x459   : > { %v936_v35 = vpack.c.bf16 %v935_v34, %v935_v34 }
 0x45b   : > { %1198 = vmatmul.mubr.msk.bf16.vlgmr.msra.gmra.mxu0 %vm573_vm2, %v936_v35 }
 0x4e6   : > { %v743_v36 = vpop.f32.mrf.mxu0 }
 0x4e7   : > { %750 = vrot.lane.b32.xlu0 %v743_v36, %s1243_s9 }
 0x4e8   : > { %v1175_v37 = vpop.f32.mrf.mxu0 }
 0x4ea   : > { %v746_v38 = vpop.f32.mrf.mxu0 }
 0x4ec   : > { %v1176_v39 = vpop.f32.mrf.mxu0 }
 0x4ee   : > { %v861_v0 = vpop.f32.mrf.mxu0 }
 0x4ef   : > { %868 = vrot.lane.b32.xlu1 %v861_v0, %s1242_s8 }
 0x4f0   : > { %v1187_v40 = vpop.f32.mrf.mxu0 }
 0x4f2   : > { %v864_v41 = vpop.f32.mrf.mxu0 }
 0x4f4   : > { %v1188_v42 = vpop.f32.mrf.mxu0 }
 0x51b   : > { %v979_v43 = vpop.f32.mrf.mxu0 }
 0x51c   : > { %986 = vrot.lane.b32.xlu0 %v979_v43, %s1241_s7 }
 0x51d   : > { %v1199_v44 = vpop.f32.mrf.mxu0 }
 0x51f   : > { %v982_v45 = vpop.f32.mrf.mxu0 }
 0x521   : > { %v1200_v46 = vpop.f32.mrf.mxu0 }
 0x559   : > { %v751_v47 = vpop.permute.xlu0 %750 }
 0x55a   : > { %754 = vst.msk [vmem:[%s1346_s18] sm:$0xff] %vm753_vm4, %v751_v47 }
 0x561   : > { %v869_v48 = vpop.permute.xlu1 %868 }
 0x562   : > { %872 = vst.msk [vmem:[%s1346_s18] sm:$0xff] %vm871_vm5, %v869_v48 }
 0x58e   : > { %v987_v49 = vpop.permute.xlu0 %986 }
 0x58f   : > { %990 = vst.msk [vmem:[%s1346_s18] sm:$0xff] %vm989_vm6, %v987_v49 }
 0x590 PF: > { %s14_s15 = sadd.s32 1, %s1237_s15  }
 0x591   : > { %p11_p7 = scmp.ge.s32.totalorder %s14_s15, 4  }
 0x593   :  { %13 = sbr.rel (!%p11_p7) target bundleno = 1 (0x1), region = 75 }

// kernel: encode_and_precompute.13
= control target key start
LH: loop header
LB: loop body
LE: loop exit
PB: predicated region body
PF: predicated region fallthrough
CT: control target
= control target key end

     0   :  { %v253_v1 = vmov 0   ;;  %v186_v20 = vlaneseq  ;;  %s343_s1 = inlined_call_operand.vmem [shape: bf16[128,256], index: 1, kind: input, shape index: {}]   ;;  %s344_s0 = inlined_call_operand.vmem [shape: f32[16,128], index: 0, kind: input, shape index: {}]   ;;  %s345_s2 = inlined_call_operand.vmem [shape: f32[1,256], index: 2, kind: input, shape index: {}]   ;;  %s346_s3 = inlined_call_operand.vmem [shape: f32[16,256], index: 3, kind: output, shape index: {}]  }
   0x1   :  { %v229_v0 = vld [vmem:[%s343_s1 + $0x74] ss:$8 sps:$4 sm:$0xff]   ;;  %158 = vmatprep.mubr.bf16.mxu0 %v253_v1  ;;  %v231_v2 = vld [vmem:[%s343_s1 + $0x70] ss:$8 sps:$4 sm:$0xff]   ;;  %v232_v3 = vld [vmem:[%s343_s1 + $0x64] ss:$8 sps:$4 sm:$0xff]  }
   0x2   :  { %126 = vmatprep.subr.bf16.mxu0 %v229_v0  ;;  %v234_v4 = vld [vmem:[%s343_s1 + $0x60] ss:$8 sps:$4 sm:$0xff]   ;;  %v235_v5 = vld [vmem:[%s343_s1 + $0x54] ss:$8 sps:$4 sm:$0xff]   ;;  %v237_v6 = vld [vmem:[%s343_s1 + $0x50] ss:$8 sps:$4 sm:$0xff]  }
   0x3   :  { %127 = vmatpush1.bf16.msra.mxu0 %v231_v2  ;;  %v238_v7 = vld [vmem:[%s343_s1 + $0x44] ss:$8 sps:$4 sm:$0xff]   ;;  %v240_v8 = vld [vmem:[%s343_s1 + $0x40] ss:$8 sps:$4 sm:$0xff]   ;;  %v241_v9 = vld [vmem:[%s343_s1 + $0x34] ss:$8 sps:$4 sm:$0xff]  }
   0x4   :  { %128 = vmatprep.subr.bf16.mxu0 %v232_v3  ;;  %v243_v10 = vld [vmem:[%s343_s1 + $0x30] ss:$8 sps:$4 sm:$0xff]   ;;  %v244_v11 = vld [vmem:[%s343_s1 + $0x24] ss:$8 sps:$4 sm:$0xff]   ;;  %v246_v12 = vld [vmem:[%s343_s1 + $0x20] ss:$8 sps:$4 sm:$0xff]  }
   0x5   :  { %v247_v13 = vld [vmem:[%s343_s1 + $0x14] ss:$8 sps:$4 sm:$0xff]   ;;  %v249_v14 = vld [vmem:[%s343_s1 + $0x10] ss:$8 sps:$4 sm:$0xff]   ;;  %v250_v15 = vld [vmem:[%s343_s1 + $0x4] ss:$8 sps:$4 sm:$0xff]  }
   0x6   :  { %v252_v16 = vld [vmem:[%s343_s1] ss:$8 sps:$4 sm:$0xff]   ;;  %v187_v21 = vshrl.u32 %v186_v20, 7 }
   0x7   :  { %129 = vmatpush1.bf16.msra.mxu0 %v234_v4  ;;  %v27_v17 = vld [vmem:[%s344_s0] sm:$0xff]  ;;  %v28_v18 = vld [vmem:[%s344_s0 + $0x8] sm:$0xff] }
   0x8   :  { %130 = vmatprep.subr.bf16.mxu0 %v235_v5  ;;  %v29_v19 = vpack.c.bf16 %v28_v18, %v27_v17  ;;  %v188_v22 = vsub.s32 0, %v187_v21  ;;  %v184_v23 = vld [vmem:[%s345_s2] sm:$0x3]  ;;  %v192_v24 = vsub.s32 1, %v187_v21 }
   0xa   :  { %v189_v25 = vrot.slane %v184_v23, %v188_v22  ;;  %v193_v26 = vrot.slane %v184_v23, %v192_v24 }
   0xb   :  { %131 = vmatpush1.bf16.msra.mxu0 %v237_v6 }
   0xc   :  { %132 = vmatprep.subr.bf16.mxu0 %v238_v7 }
   0xf   :  { %133 = vmatpush1.bf16.msra.mxu0 %v240_v8 }
  0x10   :  { %134 = vmatprep.subr.bf16.mxu0 %v241_v9 }
  0x13   :  { %135 = vmatpush1.bf16.msra.mxu0 %v243_v10 }
  0x14   :  { %136 = vmatprep.subr.bf16.mxu0 %v244_v11 }
  0x17   :  { %137 = vmatpush1.bf16.msra.mxu0 %v246_v12 }
  0x18   :  { %138 = vmatprep.subr.bf16.mxu0 %v247_v13 }
  0x1b   :  { %139 = vmatpush1.bf16.msra.mxu0 %v249_v14 }
  0x1c   :  { %140 = vmatprep.subr.bf16.mxu0 %v250_v15 }
  0x1f   :  { %141 = vmatpush1.bf16.msra.mxu0 %v252_v16 }
  0x22   :  { %159 = vmatmul.mubr.bf16.vlgmr.msra.gmra.mxu0 %v29_v19 }
  0xe2   :  { %v160_v27 = vpop.f32.mrf.mxu0 }
  0xe3   :  { %v196_v28 = vadd.f32 %v189_v25, %v160_v27 }
  0xe4   :  { %v162_v29 = vpop.f32.mrf.mxu0 }
  0xe5   :  { %v200_v30 = vmax.f32 %v196_v28, 0.0  ;;  %v197_v31 = vadd.f32 %v193_v26, %v162_v29 }
  0xe6   :  { %v164_v32 = vpop.f32.mrf.mxu0 }
  0xe7   :  { %204 = vst [vmem:[%s346_s3] sm:$0xff] %v200_v30  ;;  %v201_v33 = vmax.f32 %v197_v31, 0.0  ;;  %v198_v34 = vadd.f32 %v189_v25, %v164_v32 }
  0xe8   :  { %v166_v35 = vpop.f32.mrf.mxu0 }
  0xe9   :  { %205 = vst [vmem:[%s346_s3 + $0x8] sm:$0xff] %v201_v33  ;;  %v202_v36 = vmax.f32 %v198_v34, 0.0  ;;  %v199_v37 = vadd.f32 %v193_v26, %v166_v35 }
  0xeb   :  { %206 = vst [vmem:[%s346_s3 + $0x10] sm:$0xff] %v202_v36  ;;  %v203_v38 = vmax.f32 %v199_v37, 0.0 }
  0xed   :  { %207 = vst [vmem:[%s346_s3 + $0x18] sm:$0xff] %v203_v38 }

// kernel: encode_and_precompute.14
= control target key start
LH: loop header
LB: loop body
LE: loop exit
PB: predicated region body
PF: predicated region fallthrough
CT: control target
= control target key end

     0   :  { %s366_s1 = inlined_call_operand.vmem [shape: bf16[256,128], index: 1, kind: input, shape index: {}]   ;;  %s367_s0 = inlined_call_operand.vmem [shape: f32[16,256], index: 0, kind: input, shape index: {}]   ;;  %s368_s2 = inlined_call_operand.vmem [shape: f32[1,128], index: 2, kind: input, shape index: {}]   ;;  %s369_s3 = inlined_call_operand.vmem [shape: f32[16,128], index: 3, kind: output, shape index: {}]  }
   0x1   :  { %v261_v0 = vld [vmem:[%s366_s1 + $0x78] sm:$0xff]   ;;  %v263_v2 = vld [vmem:[%s366_s1 + $0x70] sm:$0xff]   ;;  %v265_v4 = vld [vmem:[%s366_s1 + $0x68] sm:$0xff]  }
   0x2   :  { %v262_v1 = vld [vmem:[%s366_s1 + $0x38] sm:$0xff]   ;;  %239 = vmatprep.subr.bf16.mxu0 %v261_v0  ;;  %v264_v3 = vld [vmem:[%s366_s1 + $0x30] sm:$0xff]   ;;  %v266_v5 = vld [vmem:[%s366_s1 + $0x28] sm:$0xff]  }
   0x3   :  { %240 = vmatpush3.bf16.msra.mxu0 %v262_v1  ;;  %v267_v6 = vld [vmem:[%s366_s1 + $0x60] sm:$0xff]   ;;  %v269_v8 = vld [vmem:[%s366_s1 + $0x58] sm:$0xff]   ;;  %v271_v10 = vld [vmem:[%s366_s1 + $0x50] sm:$0xff]  }
   0x4   :  { %241 = vmatprep.subr.bf16.mxu0 %v263_v2  ;;  %v268_v7 = vld [vmem:[%s366_s1 + $0x20] sm:$0xff]   ;;  %v270_v9 = vld [vmem:[%s366_s1 + $0x18] sm:$0xff]   ;;  %v24_v11 = vld [vmem:[%s367_s0 + $0x8] sm:$0xff] }
   0x5   :  { %v26_v12 = vld [vmem:[%s367_s0 + $0x18] sm:$0xff]  ;;  %v272_v14 = vld [vmem:[%s366_s1 + $0x10] sm:$0xff]   ;;  %v273_v15 = vld [vmem:[%s366_s1 + $0x48] sm:$0xff]  }
   0x6   :  { %v28_v13 = vpack.c.bf16 %v26_v12, %v24_v11  ;;  %v274_v16 = vld [vmem:[%s366_s1 + $0x8] sm:$0xff]   ;;  %v275_v17 = vld [vmem:[%s366_s1 + $0x40] sm:$0xff]   ;;  %v25_v20 = vld [vmem:[%s367_s0 + $0x10] sm:$0xff] }
   0x7   :  { %242 = vmatpush3.bf16.msra.mxu0 %v264_v3  ;;  %v276_v18 = vld [vmem:[%s366_s1] sm:$0xff]  }
   0x8   :  { %243 = vmatprep.subr.bf16.mxu0 %v265_v4  ;;  %189 = vmatprep.mubr.bf16.mxu0 %v28_v13  ;;  %v23_v19 = vld [vmem:[%s367_s0] sm:$0xff] }
   0x9   :  { %v27_v21 = vpack.c.bf16 %v25_v20, %v23_v19  ;;  %v238_v24 = vld [vmem:[%s368_s2] ss:$0 sm:$0xff] }
   0xb   :  { %244 = vmatpush3.bf16.msra.mxu0 %v266_v5 }
   0xc   :  { %245 = vmatprep.subr.bf16.mxu0 %v267_v6 }
   0xf   :  { %246 = vmatpush3.bf16.msra.mxu0 %v268_v7 }
  0x10   :  { %247 = vmatprep.subr.bf16.mxu0 %v269_v8 }
  0x13   :  { %248 = vmatpush3.bf16.msra.mxu0 %v270_v9 }
  0x14   :  { %249 = vmatprep.subr.bf16.mxu0 %v271_v10 }
  0x17   :  { %250 = vmatpush3.bf16.msra.mxu0 %v272_v14 }
  0x18   :  { %251 = vmatprep.subr.bf16.mxu0 %v273_v15 }
  0x1b   :  { %252 = vmatpush3.bf16.msra.mxu0 %v274_v16 }
  0x1c   :  { %253 = vmatprep.subr.bf16.mxu0 %v275_v17 }
  0x1f   :  { %254 = vmatpush3.bf16.msra.mxu0 %v276_v18 }
  0x22   :  { %190 = vmatmul.mubr.bf16.vlgmr.msra.gmra.mxu0 %v27_v21 }
  0xe2   :  { %v255_v22 = vpop.f32.mrf.mxu0 }
  0xe4   :  { %v256_v23 = vpop.f32.mrf.mxu0 }
  0xe5   :  { %v257_v25 = vadd.f32 %v256_v23, %v255_v22 }
  0xe6   :  { %v258_v26 = vpop.f32.mrf.mxu0 }
  0xe7   :  { %v214_v27 = vadd.f32 %v257_v25, %v238_v24 }
  0xe8   :  { %v259_v28 = vpop.f32.mrf.mxu0 }
  0xe9   :  { %216 = vst [vmem:[%s369_s3] sm:$0xff] %v214_v27  ;;  %v260_v29 = vadd.f32 %v259_v28, %v258_v26 }
  0xeb   :  { %v215_v30 = vadd.f32 %v260_v29, %v238_v24 }
  0xed   :  { %217 = vst [vmem:[%s369_s3 + $0x8] sm:$0xff] %v215_v30 }

// kernel: encode_and_precompute.17
= control target key start
LH: loop header
LB: loop body
LE: loop exit
PB: predicated region body
PF: predicated region fallthrough
CT: control target
= control target key end

     0   :  { %v249_v1 = vmov 0   ;;  %v186_v20 = vlaneseq  ;;  %s339_s1 = inlined_call_operand.vmem [shape: bf16[128,256], index: 1, kind: input, shape index: {}]   ;;  %s340_s0 = inlined_call_operand.vmem [shape: f32[16,128], index: 0, kind: input, shape index: {}]   ;;  %s341_s2 = inlined_call_operand.vmem [shape: f32[1,256], index: 2, kind: input, shape index: {}]   ;;  %s342_s3 = inlined_call_operand.vmem [shape: f32[16,256], index: 3, kind: output, shape index: {}]  }
   0x1   :  { %v225_v0 = vld [vmem:[%s339_s1 + $0x74] ss:$8 sps:$4 sm:$0xff]   ;;  %158 = vmatprep.mubr.bf16.mxu0 %v249_v1  ;;  %v227_v2 = vld [vmem:[%s339_s1 + $0x70] ss:$8 sps:$4 sm:$0xff]   ;;  %v228_v3 = vld [vmem:[%s339_s1 + $0x64] ss:$8 sps:$4 sm:$0xff]  }
   0x2   :  { %126 = vmatprep.subr.bf16.mxu0 %v225_v0  ;;  %v230_v4 = vld [vmem:[%s339_s1 + $0x60] ss:$8 sps:$4 sm:$0xff]   ;;  %v231_v5 = vld [vmem:[%s339_s1 + $0x54] ss:$8 sps:$4 sm:$0xff]   ;;  %v233_v6 = vld [vmem:[%s339_s1 + $0x50] ss:$8 sps:$4 sm:$0xff]  }
   0x3   :  { %127 = vmatpush1.bf16.msra.mxu0 %v227_v2  ;;  %v234_v7 = vld [vmem:[%s339_s1 + $0x44] ss:$8 sps:$4 sm:$0xff]   ;;  %v236_v8 = vld [vmem:[%s339_s1 + $0x40] ss:$8 sps:$4 sm:$0xff]   ;;  %v237_v9 = vld [vmem:[%s339_s1 + $0x34] ss:$8 sps:$4 sm:$0xff]  }
   0x4   :  { %128 = vmatprep.subr.bf16.mxu0 %v228_v3  ;;  %v239_v10 = vld [vmem:[%s339_s1 + $0x30] ss:$8 sps:$4 sm:$0xff]   ;;  %v240_v11 = vld [vmem:[%s339_s1 + $0x24] ss:$8 sps:$4 sm:$0xff]   ;;  %v242_v12 = vld [vmem:[%s339_s1 + $0x20] ss:$8 sps:$4 sm:$0xff]  }
   0x5   :  { %v243_v13 = vld [vmem:[%s339_s1 + $0x14] ss:$8 sps:$4 sm:$0xff]   ;;  %v245_v14 = vld [vmem:[%s339_s1 + $0x10] ss:$8 sps:$4 sm:$0xff]   ;;  %v246_v15 = vld [vmem:[%s339_s1 + $0x4] ss:$8 sps:$4 sm:$0xff]  }
   0x6   :  { %v248_v16 = vld [vmem:[%s339_s1] ss:$8 sps:$4 sm:$0xff]   ;;  %v187_v21 = vshrl.u32 %v186_v20, 7 }
   0x7   :  { %129 = vmatpush1.bf16.msra.mxu0 %v230_v4  ;;  %v27_v17 = vld [vmem:[%s340_s0] sm:$0xff]  ;;  %v28_v18 = vld [vmem:[%s340_s0 + $0x8] sm:$0xff] }
   0x8   :  { %130 = vmatprep.subr.bf16.mxu0 %v231_v5  ;;  %v29_v19 = vpack.c.bf16 %v28_v18, %v27_v17  ;;  %v188_v22 = vsub.s32 0, %v187_v21  ;;  %v184_v23 = vld [vmem:[%s341_s2] sm:$0x3]  ;;  %v192_v24 = vsub.s32 1, %v187_v21 }
   0xa   :  { %v189_v25 = vrot.slane %v184_v23, %v188_v22  ;;  %v193_v26 = vrot.slane %v184_v23, %v192_v24 }
   0xb   :  { %131 = vmatpush1.bf16.msra.mxu0 %v233_v6 }
   0xc   :  { %132 = vmatprep.subr.bf16.mxu0 %v234_v7 }
   0xf   :  { %133 = vmatpush1.bf16.msra.mxu0 %v236_v8 }
  0x10   :  { %134 = vmatprep.subr.bf16.mxu0 %v237_v9 }
  0x13   :  { %135 = vmatpush1.bf16.msra.mxu0 %v239_v10 }
  0x14   :  { %136 = vmatprep.subr.bf16.mxu0 %v240_v11 }
  0x17   :  { %137 = vmatpush1.bf16.msra.mxu0 %v242_v12 }
  0x18   :  { %138 = vmatprep.subr.bf16.mxu0 %v243_v13 }
  0x1b   :  { %139 = vmatpush1.bf16.msra.mxu0 %v245_v14 }
  0x1c   :  { %140 = vmatprep.subr.bf16.mxu0 %v246_v15 }
  0x1f   :  { %141 = vmatpush1.bf16.msra.mxu0 %v248_v16 }
  0x22   :  { %159 = vmatmul.mubr.bf16.vlgmr.msra.gmra.mxu0 %v29_v19 }
  0xe2   :  { %v160_v27 = vpop.f32.mrf.mxu0 }
  0xe3   :  { %v196_v28 = vadd.f32 %v189_v25, %v160_v27 }
  0xe4   :  { %v162_v29 = vpop.f32.mrf.mxu0 }
  0xe5   :  { %200 = vst [vmem:[%s342_s3] sm:$0xff] %v196_v28  ;;  %v197_v30 = vadd.f32 %v193_v26, %v162_v29 }
  0xe6   :  { %v164_v31 = vpop.f32.mrf.mxu0 }
  0xe7   :  { %201 = vst [vmem:[%s342_s3 + $0x8] sm:$0xff] %v197_v30  ;;  %v198_v32 = vadd.f32 %v189_v25, %v164_v31 }
  0xe8   :  { %v166_v33 = vpop.f32.mrf.mxu0 }
  0xe9   :  { %202 = vst [vmem:[%s342_s3 + $0x10] sm:$0xff] %v198_v32  ;;  %v199_v34 = vadd.f32 %v193_v26, %v166_v33 }
  0xeb   :  { %203 = vst [vmem:[%s342_s3 + $0x18] sm:$0xff] %v199_v34 }

</bundles_post_ra>
